<compile_context>
chip_gen: v7x
topology: tpu7x:2x2x1
jax: 0.10.0
libtpu: 0.0.40
codegen_flags: <defaults>
</compile_context>

<pallas_src>
import math

import numpy as np
import jax
import jax.numpy as jnp
from jax.experimental import pallas as pl
from jax.experimental.pallas import tpu as pltpu

# ---- configuration (mirrors the PyTorch module's __init__ arguments) -----------
B = 2                 # batch
C_IN = 4              # dataset_1_channels
C_OUT = 4             # dataset_2_channels (== C_IN so drift = (out - x)/dt is valid)
H = W = 16            # spatial
TIME_DIM = 32         # time_dim
BASE_F = 8            # unet_base_factor (hidden channels of the CUNet surrogate)
EPSILON = 0.01
TIMES = [0.0, 0.25, 0.5, 0.75, 1.0]
N_LAST_NO_NOISE = 1
N_STEPS = len(TIMES) - 1

BWC = B * W * C_IN     # 128  lanes of the flattened state rows (batch along lanes)
BWF = B * W * BASE_F   # 256  lanes of the flattened hidden rows

# per-step scalars baked into the unrolled trace as Python constants
DTS = [TIMES[i + 1] - TIMES[i] for i in range(N_STEPS)]
INV_DT = [1.0 / dt for dt in DTS]
NOISE_SCALE = [math.sqrt((0.0 if i >= N_STEPS - N_LAST_NO_NOISE else EPSILON) * DTS[i])
               for i in range(N_STEPS)]


def _swish(v):
    # F.silu(v) = v * sigmoid(v); explicit form lowers to EUP exp + VPU ops.
    return v * (1.0 / (1.0 + jnp.exp(-v)))


# ------------------------------- Pallas kernel -----------------------------------
def sde_kernel(x0_ref, noise_ref, tb_ref, b2_ref, m1_ref, m2_ref,
               x_out_ref, nacc_ref, xpad_ref, hpad_ref):
    """All N_STEPS Euler–Maruyama steps in one invocation.

    State layout: x is [H, B*W*C] = [16, 128] (one image row per sublane row,
    batches side by side along lanes).  A 3x3 "same" conv is:
        cat([shift_dn(x), x, shift_up(x)], lanes) @ M_cat + bias
    where shift_dn/up come from a zero-halo VMEM scratch ([H+2, lanes]) and M_cat
    stacks the three per-dy banded, batch-block-diagonal [lanes_in, lanes_out]
    matrices (the bands encode the dx taps and the zero padding along W).
    """
    # zero the halo rows once; only rows 1..H are rewritten inside the loop
    xpad_ref[...] = jnp.zeros_like(xpad_ref)
    hpad_ref[...] = jnp.zeros_like(hpad_ref)

    x = x0_ref[...]                                    # [H, BWC] f32 (loop-carried)
    nacc = jnp.zeros((H, BWC), jnp.float32)            # squared-drift accumulator
    m1 = m1_ref[...]                                   # [3*BWC, BWF]
    m2 = m2_ref[...]                                   # [3*BWF, BWC]
    b2 = b2_ref[...]                                   # [H, BWC] (pre-broadcast)

    for s in range(N_STEPS):                           # unrolled at trace time
        # ---- conv1: 3x3, C_IN -> F (one fused MXU matmul) -------------------
        xpad_ref[pl.ds(1, H), :] = x
        xcat = jnp.concatenate(
            [xpad_ref[pl.ds(0, H), :],                 # rows y-1 (zero at top)
             x,                                        # rows y
             xpad_ref[pl.ds(2, H), :]],                # rows y+1 (zero at bottom)
            axis=1)                                    # [H, 3*BWC] = [16, 384]
        h = jnp.dot(xcat, m1, preferred_element_type=jnp.float32) + tb_ref[s]
        h = _swish(h)                                  # [H, BWF] = [16, 256]

        # ---- conv2: 3x3, F -> C_OUT (one fused MXU matmul) ------------------
        hpad_ref[pl.ds(1, H), :] = h
        hcat = jnp.concatenate(
            [hpad_ref[pl.ds(0, H), :], h, hpad_ref[pl.ds(2, H), :]],
            axis=1)                                    # [H, 3*BWF] = [16, 768]
        drifted = jnp.dot(hcat, m2, preferred_element_type=jnp.float32) + b2

        # ---- Euler–Maruyama update + squared-norm accumulation --------------
        # drift*dt == drifted - x  =>  x_new = drifted + sqrt(eps*dt)*noise and
        # ||drift||^2 * dt == sum((drifted - x)^2) / dt
        diff = drifted - x
        nacc = nacc + (diff * diff) * INV_DT[s]
        if NOISE_SCALE[s] != 0.0:
            x = drifted + NOISE_SCALE[s] * noise_ref[s]
        else:                                          # no-noise final step(s)
            x = drifted

    x_out_ref[...] = x                                 # [16,128] unmasked store
    nacc_ref[...] = nacc                               # per-batch collapse in wrapper


def make_sde_call():
    def cspec(shape):
        nd = len(shape)
        return pl.BlockSpec(shape, lambda *_: (0,) * nd)

    grid_spec = pltpu.PrefetchScalarGridSpec(
        num_scalar_prefetch=0,
        grid=(1,),                                     # single invocation
        in_specs=[
            cspec((H, BWC)),                           # x0
            cspec((N_STEPS, H, BWC)),                  # all per-step noise (one DMA)
            cspec((N_STEPS, H, BWF)),                  # time bias (+conv1 bias) table
            cspec((H, BWC)),                           # conv2 bias (pre-broadcast)
            cspec((3 * BWC, BWF)),                     # fused conv1 band matrix
            cspec((3 * BWF, BWC)),                     # fused conv2 band matrix
        ],
        out_specs=(
            cspec((H, BWC)),                           # final state
            cspec((H, BWC)),                           # squared-drift accumulator
        ),
        scratch_shapes=[
            pltpu.VMEM((H + 2, BWC), jnp.float32),     # zero-halo pad for x
            pltpu.VMEM((H + 2, BWF), jnp.float32),     # zero-halo pad for h
        ],
    )
    return pl.pallas_call(
        sde_kernel,
        out_shape=(jax.ShapeDtypeStruct((H, BWC), jnp.float32),
                   jax.ShapeDtypeStruct((H, BWC), jnp.float32)),
        grid_spec=grid_spec,
        compiler_params=pltpu.CompilerParams(
            dimension_semantics=("arbitrary",)),
    )


_sde_call = make_sde_call()


# ------------------------------ parameters ---------------------------------------
def init_params(seed=42):
    key = jax.random.PRNGKey(seed)
    ks = jax.random.split(key, 10)

    def lin(k, fan_in, shape):
        return jax.random.normal(k, shape, jnp.float32) / math.sqrt(fan_in)

    inv_freq = jnp.exp(jnp.arange(0, TIME_DIM, 2, dtype=jnp.float32)
                       * (-math.log(10000.0) / TIME_DIM))
    return dict(
        inv_freq=inv_freq,
        wt1=lin(ks[0], TIME_DIM, (TIME_DIM, TIME_DIM)),
        bt1=0.01 * jax.random.normal(ks[1], (TIME_DIM,), jnp.float32),
        wt2=lin(ks[2], TIME_DIM, (TIME_DIM, TIME_DIM)),
        bt2=0.01 * jax.random.normal(ks[3], (TIME_DIM,), jnp.float32),
        wtp=lin(ks[4], TIME_DIM, (TIME_DIM, BASE_F)),
        btp=0.01 * jax.random.normal(ks[5], (BASE_F,), jnp.float32),
        w1=lin(ks[6], 9 * C_IN, (3, 3, C_IN, BASE_F)),     # [dy, dx, cin, cout]
        b1=0.01 * jax.random.normal(ks[7], (BASE_F,), jnp.float32),
        w2=lin(ks[8], 9 * BASE_F, (3, 3, BASE_F, C_OUT)),
        b2=0.01 * jax.random.normal(ks[9], (C_OUT,), jnp.float32),
    )


def _band_matrix_cat(w):
    """w: [3, 3, cin, cout] -> fused band matrix [3*B*W*cin, B*W*cout].

    Rows are (dy, b, xi, ci)-major, columns (b, xo, co)-major, block-diagonal over
    the batch.  M[dy, b, xi, ci, b, xo, co] = w[dy, xi-xo+1, ci, co] (else zero),
    so  cat([x_dn, x, x_up], lanes) @ M  performs the full 3x3 conv with "same"
    zero padding along W (the dy padding comes from the zero-halo scratch)."""
    _, _, cin, cout = w.shape
    m = np.zeros((3, B, W, cin, B, W, cout), np.float32)
    for dy in range(3):
        for dx in range(3):
            for xo in range(W):
                xi = xo + dx - 1
                if 0 <= xi < W:
                    for b in range(B):
                        m[dy, b, xi, :, b, xo, :] = w[dy, dx]
    return jnp.asarray(m.reshape(3 * B * W * cin, B * W * cout))


def _time_bias_table(params):
    """Hoisted DriftModel.time_embed + hidden-channel projection: [N_STEPS, BASE_F]."""
    tvals = jnp.asarray(TIMES[:-1], jnp.float32) * float(N_STEPS) + 1.0
    sinusoid = tvals[:, None] * params["inv_freq"][None, :]
    pos = jnp.concatenate([jnp.sin(sinusoid), jnp.cos(sinusoid)], axis=-1)
    th = _swish(pos @ params["wt1"] + params["bt1"][None, :])
    temb = th @ params["wt2"] + params["bt2"][None, :]
    return temb @ params["wtp"] + params["btp"][None, :]


def build_kernel_params(params):
    w1 = np.asarray(jax.device_get(params["w1"]), np.float32)
    w2 = np.asarray(jax.device_get(params["w2"]), np.float32)
    tbias = _time_bias_table(params)                            # [N_STEPS, F]

    # fold conv1 bias into the time-bias table, tile over (b, w), pre-broadcast over H
    tb_lane = jnp.tile(tbias + params["b1"][None, :], (1, B * W))        # [N_STEPS, BWF]
    tb_full = jnp.broadcast_to(tb_lane[:, None, :], (N_STEPS, H, BWF))
    b2_lane = jnp.tile(params["b2"], B * W)[None, :]                      # [1, BWC]
    b2_full = jnp.broadcast_to(b2_lane, (H, BWC))

    return dict(
        m1=_band_matrix_cat(w1),                                # [3*BWC, BWF]
        m2=_band_matrix_cat(w2),                                # [3*BWF, BWC]
        tb=tb_full,                                             # [N_STEPS, H, BWF]
        b2=b2_full,                                             # [H, BWC]
        tbias=tbias,                                            # raw table (for ref)
    )


# ------------------------------ forward wrapper -----------------------------------
@jax.jit
def enot_sde_forward(x_nchw, noise_nschw, kp):
    """EnotSDE.forward (create_graph=False, return_trajectory=False).

    x_nchw: [B, C, H, W] (PyTorch layout); noise_nschw: [N_STEPS, B, C, H, W].
    Returns (x_nchw_out, norm_square[B])."""
    x = jnp.transpose(x_nchw.astype(jnp.float32), (2, 0, 3, 1)).reshape(H, BWC)
    noise = jnp.transpose(noise_nschw.astype(jnp.float32),
                          (0, 3, 1, 4, 2)).reshape(N_STEPS, H, BWC)
    x_out, nacc = _sde_call(x, noise, kp["tb"], kp["b2"], kp["m1"], kp["m2"])
    x_out = x_out.reshape(H, B, W, C_OUT).transpose(1, 3, 0, 2)       # -> NCHW
    norm = nacc.reshape(H, B, W * C_OUT).sum(axis=(0, 2))             # [B]
    return x_out, norm


# ------------------------------ pure-JAX reference ---------------------------------
def _conv3x3_ref(x, w):
    xp = jnp.pad(x, ((0, 0), (1, 1), (1, 1), (0, 0)))
    hh, ww = x.shape[1], x.shape[2]
    out = jnp.zeros(x.shape[:3] + (w.shape[-1],), jnp.float32)
    for dy in range(3):
        for dx in range(3):
            out = out + jnp.einsum("bhwc,cf->bhwf",
                                   xp[:, dy:dy + hh, dx:dx + ww, :], w[dy, dx],
                                   precision=jax.lax.Precision.HIGHEST)
    return out


def reference_forward(x_nchw, params, tbias_table, noise_nschw):
    x = jnp.transpose(x_nchw, (0, 2, 3, 1)).astype(jnp.float32)
    noise = jnp.transpose(noise_nschw, (0, 1, 3, 4, 2)).astype(jnp.float32)
    norm = jnp.zeros((B,), jnp.float32)
    for i in range(N_STEPS):
        dt = TIMES[i + 1] - TIMES[i]
        h = _swish(_conv3x3_ref(x, params["w1"]) + params["b1"] + tbias_table[i])
        drifted = _conv3x3_ref(h, params["w2"]) + params["b2"]
        drift = (drifted - x) / dt
        norm = norm + jnp.sum(drift * drift, axis=(1, 2, 3)) * dt
        eps = 0.0 if i >= N_STEPS - N_LAST_NO_NOISE else EPSILON
        x = x + drift * dt + math.sqrt(eps * dt) * noise[i]
    return jnp.transpose(x, (0, 3, 1, 2)), norm


if __name__ == "__main__":
    params = init_params(42)
    kp = build_kernel_params(params)

    key = jax.random.PRNGKey(0)
    kx, knoise = jax.random.split(key)
    x = jax.random.normal(kx, (B, C_IN, H, W), jnp.float32)               # NCHW
    noise = jax.random.normal(knoise, (N_STEPS, B, C_IN, H, W), jnp.float32)

    x_out, norm_square = enot_sde_forward(x, noise, kp)
    jax.block_until_ready((x_out, norm_square))
    assert x_out.shape == (B, C_IN, H, W)
    assert norm_square.shape == (B,)

    # correctness check against a plain-JAX implementation of the same surrogate
    x_ref, norm_ref = reference_forward(x, params, kp["tbias"], noise)
    np.testing.assert_allclose(np.asarray(x_out), np.asarray(x_ref), rtol=1e-2, atol=1e-2)
    np.testing.assert_allclose(np.asarray(norm_square), np.asarray(norm_ref),
                               rtol=1e-2, atol=1e-2)

    print("KERNEL_OK")
</pallas_src>

<mosaic_0001>
module attributes {stable_mosaic.version = 11 : i64} {
  func.func @sde_kernel(%arg0: i32, %arg1: memref<16x128xf32, #tpu.memory_space<vmem>>, %arg2: memref<4x16x128xf32, #tpu.memory_space<vmem>>, %arg3: memref<4x16x256xf32, #tpu.memory_space<vmem>>, %arg4: memref<16x128xf32, #tpu.memory_space<vmem>>, %arg5: memref<384x256xf32, #tpu.memory_space<vmem>>, %arg6: memref<768x128xf32, #tpu.memory_space<vmem>>, %arg7: memref<16x128xf32, #tpu.memory_space<vmem>>, %arg8: memref<16x128xf32, #tpu.memory_space<vmem>>, %arg9: memref<18x128xf32, #tpu.memory_space<vmem>>, %arg10: memref<18x256xf32, #tpu.memory_space<vmem>>) attributes {dimension_semantics = [#tpu.dimension_semantics<arbitrary>], iteration_bounds = array<i64: 1>, scalar_prefetch = 0 : i64, scratch_operands = 2 : i64, tpu.core_type = #tpu.core_type<tc>, window_params = [{pipeline_mode = #tpu.pipeline_mode<synchronous>, transform_indices = @transform_0, window_bounds = array<i64: 16, 128>}, {pipeline_mode = #tpu.pipeline_mode<synchronous>, transform_indices = @transform_1, window_bounds = array<i64: 4, 16, 128>}, {pipeline_mode = #tpu.pipeline_mode<synchronous>, transform_indices = @transform_2, window_bounds = array<i64: 4, 16, 256>}, {pipeline_mode = #tpu.pipeline_mode<synchronous>, transform_indices = @transform_3, window_bounds = array<i64: 16, 128>}, {pipeline_mode = #tpu.pipeline_mode<synchronous>, transform_indices = @transform_4, window_bounds = array<i64: 384, 256>}, {pipeline_mode = #tpu.pipeline_mode<synchronous>, transform_indices = @transform_5, window_bounds = array<i64: 768, 128>}, {pipeline_mode = #tpu.pipeline_mode<synchronous>, transform_indices = @transform_6, window_bounds = array<i64: 16, 128>}, {pipeline_mode = #tpu.pipeline_mode<synchronous>, transform_indices = @transform_7, window_bounds = array<i64: 16, 128>}]} {
    %cst = arith.constant 0.000000e+00 : f32
    %0 = vector.broadcast %cst : f32 to vector<18x128xf32>
    %c0 = arith.constant 0 : index
    %c0_0 = arith.constant 0 : index
    %1 = vector.load %arg9[%c0, %c0_0] : memref<18x128xf32, #tpu.memory_space<vmem>>, vector<18x128xf32>
    tpu.vector_store %arg9[%c0, %c0_0], %0 {strides = array<i32>} : memref<18x128xf32, #tpu.memory_space<vmem>>, vector<18x128xf32>,
    %cst_1 = arith.constant 0.000000e+00 : f32
    %2 = vector.broadcast %cst_1 : f32 to vector<18x256xf32>
    %c0_2 = arith.constant 0 : index
    %c0_3 = arith.constant 0 : index
    %3 = vector.load %arg10[%c0_2, %c0_3] : memref<18x256xf32, #tpu.memory_space<vmem>>, vector<18x256xf32>
    tpu.vector_store %arg10[%c0_2, %c0_3], %2 {strides = array<i32>} : memref<18x256xf32, #tpu.memory_space<vmem>>, vector<18x256xf32>,
    %c0_4 = arith.constant 0 : index
    %c0_5 = arith.constant 0 : index
    %4 = vector.load %arg1[%c0_4, %c0_5] : memref<16x128xf32, #tpu.memory_space<vmem>>, vector<16x128xf32>
    %cst_6 = arith.constant 0.000000e+00 : f32
    %5 = vector.broadcast %cst_6 : f32 to vector<16x128xf32>
    %c0_7 = arith.constant 0 : index
    %c0_8 = arith.constant 0 : index
    %6 = vector.load %arg5[%c0_7, %c0_8] : memref<384x256xf32, #tpu.memory_space<vmem>>, vector<384x256xf32>
    %c0_9 = arith.constant 0 : index
    %c0_10 = arith.constant 0 : index
    %7 = vector.load %arg6[%c0_9, %c0_10] : memref<768x128xf32, #tpu.memory_space<vmem>>, vector<768x128xf32>
    %c0_11 = arith.constant 0 : index
    %c0_12 = arith.constant 0 : index
    %8 = vector.load %arg4[%c0_11, %c0_12] : memref<16x128xf32, #tpu.memory_space<vmem>>, vector<16x128xf32>
    %c1 = arith.constant 1 : index
    %c0_13 = arith.constant 0 : index
    %9 = vector.load %arg9[%c1, %c0_13] : memref<18x128xf32, #tpu.memory_space<vmem>>, vector<16x128xf32>
    tpu.vector_store %arg9[%c1, %c0_13], %4 {strides = array<i32>} : memref<18x128xf32, #tpu.memory_space<vmem>>, vector<16x128xf32>,
    %c0_14 = arith.constant 0 : index
    %c0_15 = arith.constant 0 : index
    %10 = vector.load %arg9[%c0_14, %c0_15] : memref<18x128xf32, #tpu.memory_space<vmem>>, vector<16x128xf32>
    %c2 = arith.constant 2 : index
    %c0_16 = arith.constant 0 : index
    %11 = vector.load %arg9[%c2, %c0_16] : memref<18x128xf32, #tpu.memory_space<vmem>>, vector<16x128xf32>
    %12 = tpu.concatenate %10, %4, %11 in 1 : vector<16x128xf32>, vector<16x128xf32>, vector<16x128xf32> -> vector<16x384xf32>
    %cst_17 = arith.constant dense<0.000000e+00> : vector<16x256xf32>
    %13 = tpu.matmul %12, %6, %cst_17 {dimension_numbers = #tpu.dot_dimension_numbers<[1], [0], [0], [1], [0, 0, 1, 1], [], []>} : vector<16x384xf32>, vector<384x256xf32>, vector<16x256xf32> -> vector<16x256xf32>
    %c0_18 = arith.constant 0 : index
    %c0_19 = arith.constant 0 : index
    %c0_20 = arith.constant 0 : index
    %14 = vector.load %arg3[%c0_18, %c0_19, %c0_20] : memref<4x16x256xf32, #tpu.memory_space<vmem>>, vector<1x16x256xf32>
    %15 = vector.shape_cast %14 : vector<1x16x256xf32> to vector<16x256xf32>
    %16 = arith.addf %13, %15 : vector<16x256xf32>
    %cst_21 = arith.constant 0.000000e+00 : f32
    %17 = vector.broadcast %cst_21 : f32 to vector<16x256xf32>
    %18 = arith.subf %17, %16 : vector<16x256xf32>
    %19 = math.exp %18 : vector<16x256xf32>
    %cst_22 = arith.constant 1.000000e+00 : f32
    %20 = vector.broadcast %cst_22 : f32 to vector<16x256xf32>
    %21 = arith.addf %20, %19 : vector<16x256xf32>
    %cst_23 = arith.constant 1.000000e+00 : f32
    %22 = vector.broadcast %cst_23 : f32 to vector<16x256xf32>
    %23 = arith.divf %22, %21 : vector<16x256xf32>
    %24 = arith.mulf %16, %23 : vector<16x256xf32>
    %c1_24 = arith.constant 1 : index
    %c0_25 = arith.constant 0 : index
    %25 = vector.load %arg10[%c1_24, %c0_25] : memref<18x256xf32, #tpu.memory_space<vmem>>, vector<16x256xf32>
    tpu.vector_store %arg10[%c1_24, %c0_25], %24 {strides = array<i32>} : memref<18x256xf32, #tpu.memory_space<vmem>>, vector<16x256xf32>,
    %c0_26 = arith.constant 0 : index
    %c0_27 = arith.constant 0 : index
    %26 = vector.load %arg10[%c0_26, %c0_27] : memref<18x256xf32, #tpu.memory_space<vmem>>, vector<16x256xf32>
    %c2_28 = arith.constant 2 : index
    %c0_29 = arith.constant 0 : index
    %27 = vector.load %arg10[%c2_28, %c0_29] : memref<18x256xf32, #tpu.memory_space<vmem>>, vector<16x256xf32>
    %28 = tpu.concatenate %26, %24, %27 in 1 : vector<16x256xf32>, vector<16x256xf32>, vector<16x256xf32> -> vector<16x768xf32>
    %cst_30 = arith.constant dense<0.000000e+00> : vector<16x128xf32>
    %29 = tpu.matmul %28, %7, %cst_30 {dimension_numbers = #tpu.dot_dimension_numbers<[1], [0], [0], [1], [0, 0, 1, 1], [], []>} : vector<16x768xf32>, vector<768x128xf32>, vector<16x128xf32> -> vector<16x128xf32>
    %30 = arith.addf %29, %8 : vector<16x128xf32>
    %31 = arith.subf %30, %4 : vector<16x128xf32>
    %32 = arith.mulf %31, %31 : vector<16x128xf32>
    %cst_31 = arith.constant 4.000000e+00 : f32
    %33 = vector.broadcast %cst_31 : f32 to vector<16x128xf32>
    %34 = arith.mulf %32, %33 : vector<16x128xf32>
    %35 = arith.addf %5, %34 : vector<16x128xf32>
    %c0_32 = arith.constant 0 : index
    %c0_33 = arith.constant 0 : index
    %c0_34 = arith.constant 0 : index
    %36 = vector.load %arg2[%c0_32, %c0_33, %c0_34] : memref<4x16x128xf32, #tpu.memory_space<vmem>>, vector<1x16x128xf32>
    %37 = vector.shape_cast %36 : vector<1x16x128xf32> to vector<16x128xf32>
    %cst_35 = arith.constant 5.000000e-02 : f32
    %38 = vector.broadcast %cst_35 : f32 to vector<16x128xf32>
    %39 = arith.mulf %38, %37 : vector<16x128xf32>
    %40 = arith.addf %30, %39 : vector<16x128xf32>
    %c1_36 = arith.constant 1 : index
    %c0_37 = arith.constant 0 : index
    %41 = vector.load %arg9[%c1_36, %c0_37] : memref<18x128xf32, #tpu.memory_space<vmem>>, vector<16x128xf32>
    tpu.vector_store %arg9[%c1_36, %c0_37], %40 {strides = array<i32>} : memref<18x128xf32, #tpu.memory_space<vmem>>, vector<16x128xf32>,
    %c0_38 = arith.constant 0 : index
    %c0_39 = arith.constant 0 : index
    %42 = vector.load %arg9[%c0_38, %c0_39] : memref<18x128xf32, #tpu.memory_space<vmem>>, vector<16x128xf32>
    %c2_40 = arith.constant 2 : index
    %c0_41 = arith.constant 0 : index
    %43 = vector.load %arg9[%c2_40, %c0_41] : memref<18x128xf32, #tpu.memory_space<vmem>>, vector<16x128xf32>
    %44 = tpu.concatenate %42, %40, %43 in 1 : vector<16x128xf32>, vector<16x128xf32>, vector<16x128xf32> -> vector<16x384xf32>
    %cst_42 = arith.constant dense<0.000000e+00> : vector<16x256xf32>
    %45 = tpu.matmul %44, %6, %cst_42 {dimension_numbers = #tpu.dot_dimension_numbers<[1], [0], [0], [1], [0, 0, 1, 1], [], []>} : vector<16x384xf32>, vector<384x256xf32>, vector<16x256xf32> -> vector<16x256xf32>
    %c1_43 = arith.constant 1 : index
    %c0_44 = arith.constant 0 : index
    %c0_45 = arith.constant 0 : index
    %46 = vector.load %arg3[%c1_43, %c0_44, %c0_45] : memref<4x16x256xf32, #tpu.memory_space<vmem>>, vector<1x16x256xf32>
    %47 = vector.shape_cast %46 : vector<1x16x256xf32> to vector<16x256xf32>
    %48 = arith.addf %45, %47 : vector<16x256xf32>
    %cst_46 = arith.constant 0.000000e+00 : f32
    %49 = vector.broadcast %cst_46 : f32 to vector<16x256xf32>
    %50 = arith.subf %49, %48 : vector<16x256xf32>
    %51 = math.exp %50 : vector<16x256xf32>
    %cst_47 = arith.constant 1.000000e+00 : f32
    %52 = vector.broadcast %cst_47 : f32 to vector<16x256xf32>
    %53 = arith.addf %52, %51 : vector<16x256xf32>
    %cst_48 = arith.constant 1.000000e+00 : f32
    %54 = vector.broadcast %cst_48 : f32 to vector<16x256xf32>
    %55 = arith.divf %54, %53 : vector<16x256xf32>
    %56 = arith.mulf %48, %55 : vector<16x256xf32>
    %c1_49 = arith.constant 1 : index
    %c0_50 = arith.constant 0 : index
    %57 = vector.load %arg10[%c1_49, %c0_50] : memref<18x256xf32, #tpu.memory_space<vmem>>, vector<16x256xf32>
    tpu.vector_store %arg10[%c1_49, %c0_50], %56 {strides = array<i32>} : memref<18x256xf32, #tpu.memory_space<vmem>>, vector<16x256xf32>,
    %c0_51 = arith.constant 0 : index
    %c0_52 = arith.constant 0 : index
    %58 = vector.load %arg10[%c0_51, %c0_52] : memref<18x256xf32, #tpu.memory_space<vmem>>, vector<16x256xf32>
    %c2_53 = arith.constant 2 : index
    %c0_54 = arith.constant 0 : index
    %59 = vector.load %arg10[%c2_53, %c0_54] : memref<18x256xf32, #tpu.memory_space<vmem>>, vector<16x256xf32>
    %60 = tpu.concatenate %58, %56, %59 in 1 : vector<16x256xf32>, vector<16x256xf32>, vector<16x256xf32> -> vector<16x768xf32>
    %cst_55 = arith.constant dense<0.000000e+00> : vector<16x128xf32>
    %61 = tpu.matmul %60, %7, %cst_55 {dimension_numbers = #tpu.dot_dimension_numbers<[1], [0], [0], [1], [0, 0, 1, 1], [], []>} : vector<16x768xf32>, vector<768x128xf32>, vector<16x128xf32> -> vector<16x128xf32>
    %62 = arith.addf %61, %8 : vector<16x128xf32>
    %63 = arith.subf %62, %40 : vector<16x128xf32>
    %64 = arith.mulf %63, %63 : vector<16x128xf32>
    %cst_56 = arith.constant 4.000000e+00 : f32
    %65 = vector.broadcast %cst_56 : f32 to vector<16x128xf32>
    %66 = arith.mulf %64, %65 : vector<16x128xf32>
    %67 = arith.addf %35, %66 : vector<16x128xf32>
    %c1_57 = arith.constant 1 : index
    %c0_58 = arith.constant 0 : index
    %c0_59 = arith.constant 0 : index
    %68 = vector.load %arg2[%c1_57, %c0_58, %c0_59] : memref<4x16x128xf32, #tpu.memory_space<vmem>>, vector<1x16x128xf32>
    %69 = vector.shape_cast %68 : vector<1x16x128xf32> to vector<16x128xf32>
    %cst_60 = arith.constant 5.000000e-02 : f32
    %70 = vector.broadcast %cst_60 : f32 to vector<16x128xf32>
    %71 = arith.mulf %70, %69 : vector<16x128xf32>
    %72 = arith.addf %62, %71 : vector<16x128xf32>
    %c1_61 = arith.constant 1 : index
    %c0_62 = arith.constant 0 : index
    %73 = vector.load %arg9[%c1_61, %c0_62] : memref<18x128xf32, #tpu.memory_space<vmem>>, vector<16x128xf32>
    tpu.vector_store %arg9[%c1_61, %c0_62], %72 {strides = array<i32>} : memref<18x128xf32, #tpu.memory_space<vmem>>, vector<16x128xf32>,
    %c0_63 = arith.constant 0 : index
    %c0_64 = arith.constant 0 : index
    %74 = vector.load %arg9[%c0_63, %c0_64] : memref<18x128xf32, #tpu.memory_space<vmem>>, vector<16x128xf32>
    %c2_65 = arith.constant 2 : index
    %c0_66 = arith.constant 0 : index
    %75 = vector.load %arg9[%c2_65, %c0_66] : memref<18x128xf32, #tpu.memory_space<vmem>>, vector<16x128xf32>
    %76 = tpu.concatenate %74, %72, %75 in 1 : vector<16x128xf32>, vector<16x128xf32>, vector<16x128xf32> -> vector<16x384xf32>
    %cst_67 = arith.constant dense<0.000000e+00> : vector<16x256xf32>
    %77 = tpu.matmul %76, %6, %cst_67 {dimension_numbers = #tpu.dot_dimension_numbers<[1], [0], [0], [1], [0, 0, 1, 1], [], []>} : vector<16x384xf32>, vector<384x256xf32>, vector<16x256xf32> -> vector<16x256xf32>
    %c2_68 = arith.constant 2 : index
    %c0_69 = arith.constant 0 : index
    %c0_70 = arith.constant 0 : index
    %78 = vector.load %arg3[%c2_68, %c0_69, %c0_70] : memref<4x16x256xf32, #tpu.memory_space<vmem>>, vector<1x16x256xf32>
    %79 = vector.shape_cast %78 : vector<1x16x256xf32> to vector<16x256xf32>
    %80 = arith.addf %77, %79 : vector<16x256xf32>
    %cst_71 = arith.constant 0.000000e+00 : f32
    %81 = vector.broadcast %cst_71 : f32 to vector<16x256xf32>
    %82 = arith.subf %81, %80 : vector<16x256xf32>
    %83 = math.exp %82 : vector<16x256xf32>
    %cst_72 = arith.constant 1.000000e+00 : f32
    %84 = vector.broadcast %cst_72 : f32 to vector<16x256xf32>
    %85 = arith.addf %84, %83 : vector<16x256xf32>
    %cst_73 = arith.constant 1.000000e+00 : f32
    %86 = vector.broadcast %cst_73 : f32 to vector<16x256xf32>
    %87 = arith.divf %86, %85 : vector<16x256xf32>
    %88 = arith.mulf %80, %87 : vector<16x256xf32>
    %c1_74 = arith.constant 1 : index
    %c0_75 = arith.constant 0 : index
    %89 = vector.load %arg10[%c1_74, %c0_75] : memref<18x256xf32, #tpu.memory_space<vmem>>, vector<16x256xf32>
    tpu.vector_store %arg10[%c1_74, %c0_75], %88 {strides = array<i32>} : memref<18x256xf32, #tpu.memory_space<vmem>>, vector<16x256xf32>,
    %c0_76 = arith.constant 0 : index
    %c0_77 = arith.constant 0 : index
    %90 = vector.load %arg10[%c0_76, %c0_77] : memref<18x256xf32, #tpu.memory_space<vmem>>, vector<16x256xf32>
    %c2_78 = arith.constant 2 : index
    %c0_79 = arith.constant 0 : index
    %91 = vector.load %arg10[%c2_78, %c0_79] : memref<18x256xf32, #tpu.memory_space<vmem>>, vector<16x256xf32>
    %92 = tpu.concatenate %90, %88, %91 in 1 : vector<16x256xf32>, vector<16x256xf32>, vector<16x256xf32> -> vector<16x768xf32>
    %cst_80 = arith.constant dense<0.000000e+00> : vector<16x128xf32>
    %93 = tpu.matmul %92, %7, %cst_80 {dimension_numbers = #tpu.dot_dimension_numbers<[1], [0], [0], [1], [0, 0, 1, 1], [], []>} : vector<16x768xf32>, vector<768x128xf32>, vector<16x128xf32> -> vector<16x128xf32>
    %94 = arith.addf %93, %8 : vector<16x128xf32>
    %95 = arith.subf %94, %72 : vector<16x128xf32>
    %96 = arith.mulf %95, %95 : vector<16x128xf32>
    %cst_81 = arith.constant 4.000000e+00 : f32
    %97 = vector.broadcast %cst_81 : f32 to vector<16x128xf32>
    %98 = arith.mulf %96, %97 : vector<16x128xf32>
    %99 = arith.addf %67, %98 : vector<16x128xf32>
    %c2_82 = arith.constant 2 : index
    %c0_83 = arith.constant 0 : index
    %c0_84 = arith.constant 0 : index
    %100 = vector.load %arg2[%c2_82, %c0_83, %c0_84] : memref<4x16x128xf32, #tpu.memory_space<vmem>>, vector<1x16x128xf32>
    %101 = vector.shape_cast %100 : vector<1x16x128xf32> to vector<16x128xf32>
    %cst_85 = arith.constant 5.000000e-02 : f32
    %102 = vector.broadcast %cst_85 : f32 to vector<16x128xf32>
    %103 = arith.mulf %102, %101 : vector<16x128xf32>
    %104 = arith.addf %94, %103 : vector<16x128xf32>
    %c1_86 = arith.constant 1 : index
    %c0_87 = arith.constant 0 : index
    %105 = vector.load %arg9[%c1_86, %c0_87] : memref<18x128xf32, #tpu.memory_space<vmem>>, vector<16x128xf32>
    tpu.vector_store %arg9[%c1_86, %c0_87], %104 {strides = array<i32>} : memref<18x128xf32, #tpu.memory_space<vmem>>, vector<16x128xf32>,
    %c0_88 = arith.constant 0 : index
    %c0_89 = arith.constant 0 : index
    %106 = vector.load %arg9[%c0_88, %c0_89] : memref<18x128xf32, #tpu.memory_space<vmem>>, vector<16x128xf32>
    %c2_90 = arith.constant 2 : index
    %c0_91 = arith.constant 0 : index
    %107 = vector.load %arg9[%c2_90, %c0_91] : memref<18x128xf32, #tpu.memory_space<vmem>>, vector<16x128xf32>
    %108 = tpu.concatenate %106, %104, %107 in 1 : vector<16x128xf32>, vector<16x128xf32>, vector<16x128xf32> -> vector<16x384xf32>
    %cst_92 = arith.constant dense<0.000000e+00> : vector<16x256xf32>
    %109 = tpu.matmul %108, %6, %cst_92 {dimension_numbers = #tpu.dot_dimension_numbers<[1], [0], [0], [1], [0, 0, 1, 1], [], []>} : vector<16x384xf32>, vector<384x256xf32>, vector<16x256xf32> -> vector<16x256xf32>
    %c3 = arith.constant 3 : index
    %c0_93 = arith.constant 0 : index
    %c0_94 = arith.constant 0 : index
    %110 = vector.load %arg3[%c3, %c0_93, %c0_94] : memref<4x16x256xf32, #tpu.memory_space<vmem>>, vector<1x16x256xf32>
    %111 = vector.shape_cast %110 : vector<1x16x256xf32> to vector<16x256xf32>
    %112 = arith.addf %109, %111 : vector<16x256xf32>
    %cst_95 = arith.constant 0.000000e+00 : f32
    %113 = vector.broadcast %cst_95 : f32 to vector<16x256xf32>
    %114 = arith.subf %113, %112 : vector<16x256xf32>
    %115 = math.exp %114 : vector<16x256xf32>
    %cst_96 = arith.constant 1.000000e+00 : f32
    %116 = vector.broadcast %cst_96 : f32 to vector<16x256xf32>
    %117 = arith.addf %116, %115 : vector<16x256xf32>
    %cst_97 = arith.constant 1.000000e+00 : f32
    %118 = vector.broadcast %cst_97 : f32 to vector<16x256xf32>
    %119 = arith.divf %118, %117 : vector<16x256xf32>
    %120 = arith.mulf %112, %119 : vector<16x256xf32>
    %c1_98 = arith.constant 1 : index
    %c0_99 = arith.constant 0 : index
    %121 = vector.load %arg10[%c1_98, %c0_99] : memref<18x256xf32, #tpu.memory_space<vmem>>, vector<16x256xf32>
    tpu.vector_store %arg10[%c1_98, %c0_99], %120 {strides = array<i32>} : memref<18x256xf32, #tpu.memory_space<vmem>>, vector<16x256xf32>,
    %c0_100 = arith.constant 0 : index
    %c0_101 = arith.constant 0 : index
    %122 = vector.load %arg10[%c0_100, %c0_101] : memref<18x256xf32, #tpu.memory_space<vmem>>, vector<16x256xf32>
    %c2_102 = arith.constant 2 : index
    %c0_103 = arith.constant 0 : index
    %123 = vector.load %arg10[%c2_102, %c0_103] : memref<18x256xf32, #tpu.memory_space<vmem>>, vector<16x256xf32>
    %124 = tpu.concatenate %122, %120, %123 in 1 : vector<16x256xf32>, vector<16x256xf32>, vector<16x256xf32> -> vector<16x768xf32>
    %cst_104 = arith.constant dense<0.000000e+00> : vector<16x128xf32>
    %125 = tpu.matmul %124, %7, %cst_104 {dimension_numbers = #tpu.dot_dimension_numbers<[1], [0], [0], [1], [0, 0, 1, 1], [], []>} : vector<16x768xf32>, vector<768x128xf32>, vector<16x128xf32> -> vector<16x128xf32>
    %126 = arith.addf %125, %8 : vector<16x128xf32>
    %127 = arith.subf %126, %104 : vector<16x128xf32>
    %128 = arith.mulf %127, %127 : vector<16x128xf32>
    %cst_105 = arith.constant 4.000000e+00 : f32
    %129 = vector.broadcast %cst_105 : f32 to vector<16x128xf32>
    %130 = arith.mulf %128, %129 : vector<16x128xf32>
    %131 = arith.addf %99, %130 : vector<16x128xf32>
    %c0_106 = arith.constant 0 : index
    %c0_107 = arith.constant 0 : index
    %132 = vector.load %arg7[%c0_106, %c0_107] : memref<16x128xf32, #tpu.memory_space<vmem>>, vector<16x128xf32>
    tpu.vector_store %arg7[%c0_106, %c0_107], %126 {strides = array<i32>} : memref<16x128xf32, #tpu.memory_space<vmem>>, vector<16x128xf32>,
    %c0_108 = arith.constant 0 : index
    %c0_109 = arith.constant 0 : index
    %133 = vector.load %arg8[%c0_108, %c0_109] : memref<16x128xf32, #tpu.memory_space<vmem>>, vector<16x128xf32>
    tpu.vector_store %arg8[%c0_108, %c0_109], %131 {strides = array<i32>} : memref<16x128xf32, #tpu.memory_space<vmem>>, vector<16x128xf32>,
    return
  }
  func.func @transform_0(%arg0: i32) -> (i32, i32) {
    %c0_i32 = arith.constant 0 : i32
    %c0_i32_0 = arith.constant 0 : i32
    %c0_i32_1 = arith.constant 0 : i32
    return %c0_i32, %c0_i32_0 : i32, i32
  }
  func.func @transform_1(%arg0: i32) -> (i32, i32, i32) {
    %c0_i32 = arith.constant 0 : i32
    %c0_i32_0 = arith.constant 0 : i32
    %c0_i32_1 = arith.constant 0 : i32
    %c0_i32_2 = arith.constant 0 : i32
    return %c0_i32, %c0_i32_0, %c0_i32_1 : i32, i32, i32
  }
  func.func @transform_2(%arg0: i32) -> (i32, i32, i32) {
    %c0_i32 = arith.constant 0 : i32
    %c0_i32_0 = arith.constant 0 : i32
    %c0_i32_1 = arith.constant 0 : i32
    %c0_i32_2 = arith.constant 0 : i32
    return %c0_i32, %c0_i32_0, %c0_i32_1 : i32, i32, i32
  }
  func.func @transform_3(%arg0: i32) -> (i32, i32) {
    %c0_i32 = arith.constant 0 : i32
    %c0_i32_0 = arith.constant 0 : i32
    %c0_i32_1 = arith.constant 0 : i32
    return %c0_i32, %c0_i32_0 : i32, i32
  }
  func.func @transform_4(%arg0: i32) -> (i32, i32) {
    %c0_i32 = arith.constant 0 : i32
    %c0_i32_0 = arith.constant 0 : i32
    %c0_i32_1 = arith.constant 0 : i32
    return %c0_i32, %c0_i32_0 : i32, i32
  }
  func.func @transform_5(%arg0: i32) -> (i32, i32) {
    %c0_i32 = arith.constant 0 : i32
    %c0_i32_0 = arith.constant 0 : i32
    %c0_i32_1 = arith.constant 0 : i32
    return %c0_i32, %c0_i32_0 : i32, i32
  }
  func.func @transform_6(%arg0: i32) -> (i32, i32) {
    %c0_i32 = arith.constant 0 : i32
    %c0_i32_0 = arith.constant 0 : i32
    %c0_i32_1 = arith.constant 0 : i32
    return %c0_i32, %c0_i32_0 : i32, i32
  }
  func.func @transform_7(%arg0: i32) -> (i32, i32) {
    %c0_i32 = arith.constant 0 : i32
    %c0_i32_0 = arith.constant 0 : i32
    %c0_i32_1 = arith.constant 0 : i32
    return %c0_i32, %c0_i32_0 : i32, i32
  }
}

</mosaic_0001>

<bundles_post_ra>
// kernel: enot_sde_forward.1
= control target key start
LH: loop header
LB: loop body
LE: loop exit
PB: predicated region body
PF: predicated region fallthrough
CT: control target
= control target key end

     0   :  { %v4948_v3 = vmov 0.0   ;;  %vm426_vm0 = vcmask 1040384   ;;  %vm459_vm1 = vcmask 1045504   ;;  %s4940_s4 = inlined_call_operand.vmem [shape: f32[384,256], index: 4, kind: input, shape index: {}]   ;;  %s4941_s0 = inlined_call_operand.vmem [shape: f32[16,128], index: 0, kind: input, shape index: {}]   ;;  %s4942_s5 = inlined_call_operand.vmem [shape: f32[768,128], index: 5, kind: input, shape index: {}]   ;;  %s4943_s2 = inlined_call_operand.vmem [shape: f32[4,16,256], index: 2, kind: input, shape index: {}]   ;;  %s4944_s3 = inlined_call_operand.vmem [shape: f32[16,128], index: 3, kind: input, shape index: {}]   ;;  %s4945_s1 = inlined_call_operand.vmem [shape: f32[4,16,128], index: 1, kind: input, shape index: {}]   ;;  %s4946_s6 = inlined_call_operand.vmem [shape: f32[16,128], index: 6, kind: output, shape index: {0}]   ;;  %s4947_s7 = inlined_call_operand.vmem [shape: f32[16,128], index: 7, kind: output, shape index: {1}]  }
   0x1   :  { %v37_v0 = vld [vmem:[%s4940_s4 + $0x8] sm:$0xff]  ;;  %v39_v1 = vld [vmem:[%s4940_s4 + $0x18] sm:$0xff]  ;;  %v36_v2 = vld [vmem:[%s4940_s4] sm:$0xff]  ;;  %25 = vst [vmem:[#allocation2] sm:$0xff] %v4948_v3 }
   0x2   :  { %26 = vst [vmem:[#allocation2 + $0x8] sm:$0xff] %v4948_v3  ;;  %27 = vst [vmem:[#allocation2 + $0x10] sm:$0x3] %v4948_v3  ;;  %v3563_v4 = vpack.c.bf16 %v39_v1, %v37_v0  ;;  %v38_v5 = vld [vmem:[%s4940_s4 + $0x10] sm:$0xff]  ;;  %v41_v6 = vld [vmem:[%s4940_s4 + $0x28] sm:$0xff] }
   0x3   :  { %28 = vst [vmem:[#allocation3] sm:$0xff] %v4948_v3  ;;  %29 = vst [vmem:[#allocation3 + $0x8] sm:$0xff] %v4948_v3  ;;  %v43_v7 = vld [vmem:[%s4940_s4 + $0x38] sm:$0xff]  ;;  %v3574_v8 = vpack.c.bf16 %v38_v5, %v36_v2  ;;  %v40_v10 = vld [vmem:[%s4940_s4 + $0x20] sm:$0xff] }
   0x4   :  { %32 = vst [vmem:[#allocation3 + $0x20] sm:$0x3] %v4948_v3  ;;  %33 = vst [vmem:[#allocation3 + $0x28] sm:$0x3] %v4948_v3  ;;  %v3576_v9 = vpack.c.bf16 %v43_v7, %v41_v6  ;;  %v42_v11 = vld [vmem:[%s4940_s4 + $0x30] sm:$0xff]  ;;  %v45_v12 = vld [vmem:[%s4940_s4 + $0x48] sm:$0xff]  ;;  %2640 = vmatprep.subr.bf16.mxu0 %v3563_v4 }
   0x5   :  { %v47_v13 = vld [vmem:[%s4940_s4 + $0x58] sm:$0xff]  ;;  %2642 = vmatpush1.bf16.msra.mxu0 %v3574_v8  ;;  %v3592_v14 = vpack.c.bf16 %v42_v11, %v40_v10  ;;  %v44_v16 = vld [vmem:[%s4940_s4 + $0x40] sm:$0xff]  ;;  %v46_v17 = vld [vmem:[%s4940_s4 + $0x50] sm:$0xff] }
   0x6   :  { %5079 = vst [vmem:[#allocation4_spill] sm:$0xff] %v3576_v9  ;;  %2644 = vmatprep.subr.bf16.mxu0 %v3576_v9  ;;  %v3595_v15 = vpack.c.bf16 %v47_v13, %v45_v12  ;;  %v49_v18 = vld [vmem:[%s4940_s4 + $0x68] sm:$0xff]  ;;  %v51_v19 = vld [vmem:[%s4940_s4 + $0x78] sm:$0xff]  ;;  %v3610_v20 = vpack.c.bf16 %v46_v17, %v44_v16  ;;  %v48_v22 = vld [vmem:[%s4940_s4 + $0x60] sm:$0xff] }
   0x7   :  { %5080 = vst [vmem:[#allocation5_spill] sm:$0xff] %v3592_v14  ;;  %v3613_v21 = vpack.c.bf16 %v51_v19, %v49_v18  ;;  %v50_v23 = vld [vmem:[%s4940_s4 + $0x70] sm:$0xff]  ;;  %v53_v24 = vld [vmem:[%s4940_s4 + $0x88] sm:$0xff]  ;;  %v55_v25 = vld [vmem:[%s4940_s4 + $0x98] sm:$0xff] }
   0x8   :  { %5081 = vst [vmem:[#allocation6_spill] sm:$0xff] %v3595_v15  ;;  %5082 = vst [vmem:[#allocation7_spill] sm:$0xff] %v3610_v20  ;;  %v3628_v26 = vpack.c.bf16 %v50_v23, %v48_v22  ;;  %v3631_v27 = vpack.c.bf16 %v55_v25, %v53_v24  ;;  %v52_v28 = vld [vmem:[%s4940_s4 + $0x80] sm:$0xff]  ;;  %v54_v29 = vld [vmem:[%s4940_s4 + $0x90] sm:$0xff] }
   0x9   :  { %2646 = vmatpush1.bf16.msra.mxu0 %v3592_v14  ;;  %5083 = vst [vmem:[#allocation8_spill] sm:$0xff] %v3613_v21  ;;  %v57_v30 = vld [vmem:[%s4940_s4 + $0xa8] sm:$0xff]  ;;  %v59_v31 = vld [vmem:[%s4940_s4 + $0xb8] sm:$0xff]  ;;  %v3646_v32 = vpack.c.bf16 %v54_v29, %v52_v28  ;;  %v56_v34 = vld [vmem:[%s4940_s4 + $0xa0] sm:$0xff] }
   0xa   :  { %2648 = vmatprep.subr.bf16.mxu0 %v3595_v15  ;;  %5084 = vst [vmem:[#allocation9_spill] sm:$0xff] %v3628_v26  ;;  %5085 = vst [vmem:[#allocation10_spill] sm:$0xff] %v3631_v27  ;;  %v3649_v33 = vpack.c.bf16 %v59_v31, %v57_v30  ;;  %v58_v35 = vld [vmem:[%s4940_s4 + $0xb0] sm:$0xff]  ;;  %v61_v36 = vld [vmem:[%s4940_s4 + $0xc8] sm:$0xff] }
   0xb   :  { %5086 = vst [vmem:[#allocation11_spill] sm:$0xff] %v3646_v32  ;;  %v63_v37 = vld [vmem:[%s4940_s4 + $0xd8] sm:$0xff]  ;;  %v3664_v38 = vpack.c.bf16 %v58_v35, %v56_v34  ;;  %v60_v40 = vld [vmem:[%s4940_s4 + $0xc0] sm:$0xff]  ;;  %v62_v41 = vld [vmem:[%s4940_s4 + $0xd0] sm:$0xff] }
   0xc   :  { %5087 = vst [vmem:[#allocation12_spill] sm:$0xff] %v3649_v33  ;;  %v3667_v39 = vpack.c.bf16 %v63_v37, %v61_v36  ;;  %v3678_v42 = vld [vmem:[%s4941_s0] sm:$0xff]  ;;  %v65_v43 = vld [vmem:[%s4940_s4 + $0xe8] sm:$0xff]  ;;  %v67_v44 = vld [vmem:[%s4940_s4 + $0xf8] sm:$0xff]  ;;  %v3689_v45 = vpack.c.bf16 %v62_v41, %v60_v40 }
   0xd   :  { %2650 = vmatpush1.bf16.msra.mxu0 %v3610_v20  ;;  %5088 = vst [vmem:[#allocation13_spill] sm:$0xff] %v3664_v38  ;;  %5090 = vst [vmem:[#allocation15_spill] sm:$0xff] %v3678_v42  ;;  %304 = vmatprep.mubr.f32.mxu0 %v3678_v42  ;;  %v3692_v46 = vpack.c.bf16 %v67_v44, %v65_v43  ;;  %v64_v47 = vld [vmem:[%s4940_s4 + $0xe0] sm:$0xff]  ;;  %v66_v48 = vld [vmem:[%s4940_s4 + $0xf0] sm:$0xff] }
   0xe   :  { %2652 = vmatprep.subr.bf16.mxu0 %v3613_v21  ;;  %5089 = vst [vmem:[#allocation14_spill] sm:$0xff] %v3667_v39  ;;  %230 = vst [vmem:[#allocation2 + $0x1] sm:$0xff] %v3678_v42  ;;  %v69_v49 = vld [vmem:[%s4940_s4 + $0x108] sm:$0xff]  ;;  %v71_v50 = vld [vmem:[%s4940_s4 + $0x118] sm:$0xff]  ;;  %v3707_v51 = vpack.c.bf16 %v66_v48, %v64_v47 }
   0xf   :  { %5091 = vst [vmem:[#allocation16_spill] sm:$0xff] %v3689_v45  ;;  %5092 = vst [vmem:[#allocation17_spill] sm:$0xff] %v3692_v46  ;;  %v3710_v52 = vpack.c.bf16 %v71_v50, %v69_v49  ;;  %v68_v53 = vld [vmem:[%s4940_s4 + $0x100] sm:$0xff]  ;;  %v70_v54 = vld [vmem:[%s4940_s4 + $0x110] sm:$0xff] }
  0x10   :  { %5093 = vst [vmem:[#allocation18_spill] sm:$0xff] %v3707_v51  ;;  %v73_v55 = vld [vmem:[%s4940_s4 + $0x128] sm:$0xff]  ;;  %v75_v56 = vld [vmem:[%s4940_s4 + $0x138] sm:$0xff]  ;;  %v3730_v58 = vpack.c.bf16 %v70_v54, %v68_v53  ;;  %v72_v60 = vld [vmem:[%s4940_s4 + $0x120] sm:$0xff] }
  0x11   :  { %2654 = vmatpush1.bf16.msra.mxu0 %v3628_v26  ;;  %5094 = vst [vmem:[#allocation19_spill] sm:$0xff] %v3710_v52  ;;  %v3727_v57 = vld [vmem:[%s4941_s0 + $0x8] sm:$0xff]  ;;  %v3734_v59 = vpack.c.bf16 %v75_v56, %v73_v55  ;;  %v74_v61 = vld [vmem:[%s4940_s4 + $0x130] sm:$0xff]  ;;  %v79_v63 = vld [vmem:[%s4940_s4 + $0x158] sm:$0xff] }
  0x12   :  { %2656 = vmatprep.subr.bf16.mxu0 %v3631_v27  ;;  %5095 = vst [vmem:[#allocation20_spill] sm:$0xff] %v3727_v57  ;;  %5096 = vst [vmem:[#allocation21_spill] sm:$0xff] %v3730_v58  ;;  %v77_v62 = vld [vmem:[%s4940_s4 + $0x148] sm:$0xff]  ;;  %v3749_v0 = vpack.c.bf16 %v74_v61, %v72_v60  ;;  %v76_v2 = vld [vmem:[%s4940_s4 + $0x140] sm:$0xff] }
  0x13   :  { %231 = vst [vmem:[#allocation2 + $0x9] sm:$0xff] %v3727_v57  ;;  %5097 = vst [vmem:[#allocation22_spill] sm:$0xff] %v3734_v59  ;;  %v3752_v1 = vpack.c.bf16 %v79_v63, %v77_v62  ;;  %v78_v5 = vld [vmem:[%s4940_s4 + $0x150] sm:$0xff]  ;;  %v81_v6 = vld [vmem:[%s4940_s4 + $0x168] sm:$0xff] }
  0x14   :  { %5098 = vst [vmem:[#allocation23_spill] sm:$0xff] %v3749_v0  ;;  %v83_v7 = vld [vmem:[%s4940_s4 + $0x178] sm:$0xff]  ;;  %v3767_v10 = vpack.c.bf16 %v78_v5, %v76_v2  ;;  %v80_v12 = vld [vmem:[%s4940_s4 + $0x160] sm:$0xff]  ;;  %v82_v13 = vld [vmem:[%s4940_s4 + $0x170] sm:$0xff] }
  0x15   :  { %2658 = vmatpush1.bf16.msra.mxu0 %v3646_v32  ;;  %5099 = vst [vmem:[#allocation24_spill] sm:$0xff] %v3752_v1  ;;  %v3770_v11 = vpack.c.bf16 %v83_v7, %v81_v6  ;;  %v85_v16 = vld [vmem:[%s4940_s4 + $0x188] sm:$0xff]  ;;  %v87_v17 = vld [vmem:[%s4940_s4 + $0x198] sm:$0xff]  ;;  %v3785_v18 = vpack.c.bf16 %v82_v13, %v80_v12  ;;  %v84_v22 = vld [vmem:[%s4940_s4 + $0x180] sm:$0xff] }
  0x16   :  { %2660 = vmatprep.subr.bf16.mxu0 %v3649_v33  ;;  %5100 = vst [vmem:[#allocation25_spill] sm:$0xff] %v3767_v10  ;;  %v3788_v19 = vpack.c.bf16 %v87_v17, %v85_v16  ;;  %v86_v23 = vld [vmem:[%s4940_s4 + $0x190] sm:$0xff]  ;;  %v89_v24 = vld [vmem:[%s4940_s4 + $0x1a8] sm:$0xff]  ;;  %v91_v25 = vld [vmem:[%s4940_s4 + $0x1b8] sm:$0xff] }
  0x17   :  { %5101 = vst [vmem:[#allocation26_spill] sm:$0xff] %v3770_v11  ;;  %5102 = vst [vmem:[#allocation27_spill] sm:$0xff] %v3785_v18  ;;  %v3803_v28 = vpack.c.bf16 %v86_v23, %v84_v22  ;;  %v3806_v29 = vpack.c.bf16 %v91_v25, %v89_v24  ;;  %v88_v30 = vld [vmem:[%s4940_s4 + $0x1a0] sm:$0xff]  ;;  %v90_v31 = vld [vmem:[%s4940_s4 + $0x1b0] sm:$0xff] }
  0x18   :  { %5103 = vst [vmem:[#allocation28_spill] sm:$0xff] %v3788_v19  ;;  %v93_v34 = vld [vmem:[%s4940_s4 + $0x1c8] sm:$0xff]  ;;  %v95_v35 = vld [vmem:[%s4940_s4 + $0x1d8] sm:$0xff]  ;;  %v3821_v36 = vpack.c.bf16 %v90_v31, %v88_v30  ;;  %v92_v40 = vld [vmem:[%s4940_s4 + $0x1c0] sm:$0xff] }
  0x19   :  { %2662 = vmatpush1.bf16.msra.mxu0 %v3664_v38  ;;  %5104 = vst [vmem:[#allocation29_spill] sm:$0xff] %v3803_v28  ;;  %5105 = vst [vmem:[#allocation30_spill] sm:$0xff] %v3806_v29  ;;  %v3824_v37 = vpack.c.bf16 %v95_v35, %v93_v34  ;;  %v94_v41 = vld [vmem:[%s4940_s4 + $0x1d0] sm:$0xff]  ;;  %v97_v43 = vld [vmem:[%s4940_s4 + $0x1e8] sm:$0xff] }
  0x1a   :  { %2664 = vmatprep.subr.bf16.mxu0 %v3667_v39  ;;  %5106 = vst [vmem:[#allocation31_spill] sm:$0xff] %v3821_v36  ;;  %v99_v44 = vld [vmem:[%s4940_s4 + $0x1f8] sm:$0xff]  ;;  %v3839_v47 = vpack.c.bf16 %v94_v41, %v92_v40  ;;  %v96_v49 = vld [vmem:[%s4940_s4 + $0x1e0] sm:$0xff]  ;;  %v98_v50 = vld [vmem:[%s4940_s4 + $0x1f0] sm:$0xff] }
  0x1b   :  { %5107 = vst [vmem:[#allocation32_spill] sm:$0xff] %v3824_v37  ;;  %v3842_v48 = vpack.c.bf16 %v99_v44, %v97_v43  ;;  %v101_v53 = vld [vmem:[%s4940_s4 + $0x208] sm:$0xff]  ;;  %v103_v54 = vld [vmem:[%s4940_s4 + $0x218] sm:$0xff]  ;;  %v3857_v55 = vpack.c.bf16 %v98_v50, %v96_v49  ;;  %v100_v60 = vld [vmem:[%s4940_s4 + $0x200] sm:$0xff] }
  0x1c   :  { %5108 = vst [vmem:[#allocation33_spill] sm:$0xff] %v3839_v47  ;;  %v3860_v56 = vpack.c.bf16 %v103_v54, %v101_v53  ;;  %v102_v61 = vld [vmem:[%s4940_s4 + $0x210] sm:$0xff]  ;;  %v105_v62 = vld [vmem:[%s4940_s4 + $0x228] sm:$0xff]  ;;  %v107_v63 = vld [vmem:[%s4940_s4 + $0x238] sm:$0xff] }
  0x1d   :  { %2666 = vmatpush1.bf16.msra.mxu0 %v3689_v45  ;;  %5109 = vst [vmem:[#allocation34_spill] sm:$0xff] %v3842_v48  ;;  %5110 = vst [vmem:[#allocation35_spill] sm:$0xff] %v3857_v55  ;;  %v232_v2 = vld [vmem:[#allocation2] sm:$0xff]  ;;  %v3875_v5 = vpack.c.bf16 %v102_v61, %v100_v60  ;;  %v3878_v6 = vpack.c.bf16 %v107_v63, %v105_v62  ;;  %v106_v12 = vld [vmem:[%s4940_s4 + $0x230] sm:$0xff] }
  0x1e   :  { %2668 = vmatprep.subr.bf16.mxu0 %v3692_v46  ;;  %5111 = vst [vmem:[#allocation36_spill] sm:$0xff] %v3860_v56  ;;  %v104_v7 = vld [vmem:[%s4940_s4 + $0x220] sm:$0xff]  ;;  %v109_v13 = vld [vmem:[%s4940_s4 + $0x248] sm:$0xff]  ;;  %v111_v16 = vld [vmem:[%s4940_s4 + $0x258] sm:$0xff] }
  0x1f   :  { %v3893_v17 = vpack.c.bf16 %v106_v12, %v104_v7  ;;  %v233_v22 = vld [vmem:[#allocation2 + $0x8] sm:$0xff]  ;;  %v3897_v23 = vpack.c.bf16 %v111_v16, %v109_v13  ;;  %v108_v24 = vld [vmem:[%s4940_s4 + $0x240] sm:$0xff]  ;;  %v110_v25 = vld [vmem:[%s4940_s4 + $0x250] sm:$0xff] }
  0x20   :  { %v113_v30 = vld [vmem:[%s4940_s4 + $0x268] sm:$0xff]  ;;  %v115_v31 = vld [vmem:[%s4940_s4 + $0x278] sm:$0xff]  ;;  %v3912_v34 = vpack.c.bf16 %v110_v25, %v108_v24  ;;  %v112_v40 = vld [vmem:[%s4940_s4 + $0x260] sm:$0xff] }
  0x21   :  { %2670 = vmatpush1.bf16.msra.mxu0 %v3707_v51  ;;  %v3916_v35 = vpack.c.bf16 %v115_v31, %v113_v30  ;;  %v114_v41 = vld [vmem:[%s4940_s4 + $0x270] sm:$0xff]  ;;  %v117_v43 = vld [vmem:[%s4940_s4 + $0x288] sm:$0xff]  ;;  %v119_v44 = vld [vmem:[%s4940_s4 + $0x298] sm:$0xff] }
  0x22   :  { %2672 = vmatprep.subr.bf16.mxu0 %v3710_v52  ;;  %v3931_v49 = vpack.c.bf16 %v114_v41, %v112_v40  ;;  %v3934_v50 = vpack.c.bf16 %v119_v44, %v117_v43  ;;  %v116_v53 = vld [vmem:[%s4940_s4 + $0x280] sm:$0xff]  ;;  %v118_v54 = vld [vmem:[%s4940_s4 + $0x290] sm:$0xff]  ;;  %v121_v60 = vld [vmem:[%s4940_s4 + $0x2a8] sm:$0xff] }
  0x23   :  { %v123_v61 = vld [vmem:[%s4940_s4 + $0x2b8] sm:$0xff]  ;;  %v3949_v62 = vpack.c.bf16 %v118_v54, %v116_v53  ;;  %v122_v7 = vld [vmem:[%s4940_s4 + $0x2b0] sm:$0xff]  ;;  %v125_v12 = vld [vmem:[%s4940_s4 + $0x2c8] sm:$0xff] }
  0x24   :  { %v3952_v63 = vpack.c.bf16 %v123_v61, %v121_v60  ;;  %v127_v13 = vld [vmem:[%s4940_s4 + $0x2d8] sm:$0xff]  ;;  %v124_v24 = vld [vmem:[%s4940_s4 + $0x2c0] sm:$0xff]  ;;  %v126_v25 = vld [vmem:[%s4940_s4 + $0x2d0] sm:$0xff] }
  0x25   :  { %2674 = vmatpush1.bf16.msra.mxu0 %v3730_v58  ;;  %v129_v30 = vld [vmem:[%s4940_s4 + $0x2e8] sm:$0xff]  ;;  %v131_v31 = vld [vmem:[%s4940_s4 + $0x2f8] sm:$0xff]  ;;  %v3985_v40 = vpack.c.bf16 %v126_v25, %v124_v24  ;;  %v128_v43 = vld [vmem:[%s4940_s4 + $0x2e0] sm:$0xff] }
  0x26   :  { %2676 = vmatprep.subr.bf16.mxu0 %v3734_v59  ;;  %v3988_v41 = vpack.c.bf16 %v131_v31, %v129_v30  ;;  %v130_v44 = vld [vmem:[%s4940_s4 + $0x2f0] sm:$0xff]  ;;  %v234_v54 = vld [vmem:[#allocation2 + $0x2] sm:$0xff]  ;;  %v151_v30 = vld [vmem:[%s4942_s5 + $0x98] sm:$0xff] }
  0x27   :  { %v3997_v53 = vpack.c.bf16 %v130_v44, %v128_v43  ;;  %v235_v60 = vld [vmem:[#allocation2 + $0xa] sm:$0xff]  ;;  %v148_v61 = vld [vmem:[%s4942_s5 + $0x80] sm:$0xff]  ;;  %v135_v44 = vld [vmem:[%s4942_s5 + $0x18] sm:$0xff] }
  0x28   :  { %v150_v25 = vld [vmem:[%s4942_s5 + $0x90] sm:$0xff] }
  0x29   :  { %2678 = vmatpush1.bf16.msra.mxu0 %v3749_v0  ;;  %v4059_v31 = vpack.c.bf16 %v151_v30, %v150_v25  ;;  %v134_v43 = vld [vmem:[%s4942_s5 + $0x10] sm:$0xff] }
  0x2a   :  { %2680 = vmatprep.subr.bf16.mxu0 %v3752_v1  ;;  %v154_v30 = vld [vmem:[%s4942_s5 + $0xb0] sm:$0xff] }
  0x2b   :  { %v142_v42 = vld [vmem:[%s4942_s5 + $0x50] sm:$0xff] }
  0x2d   :  { %2682 = vmatpush1.bf16.msra.mxu0 %v3767_v10 }
  0x2e   :  { %2684 = vmatprep.subr.bf16.mxu0 %v3770_v11 }
  0x31   :  { %2686 = vmatpush1.bf16.msra.mxu0 %v3785_v18 }
  0x32   :  { %2688 = vmatprep.subr.bf16.mxu0 %v3788_v19 }
  0x35   :  { %2690 = vmatpush1.bf16.msra.mxu0 %v3803_v28 }
  0x36   :  { %2692 = vmatprep.subr.bf16.mxu0 %v3806_v29 }
  0x39   :  { %2694 = vmatpush1.bf16.msra.mxu0 %v3821_v36 }
  0x3a   :  { %2696 = vmatprep.subr.bf16.mxu0 %v3824_v37 }
  0x3d   :  { %2698 = vmatpush1.bf16.msra.mxu0 %v3839_v47 }
  0x3e   :  { %2700 = vmatprep.subr.bf16.mxu0 %v3842_v48 }
  0x41   :  { %2702 = vmatpush1.bf16.msra.mxu0 %v3857_v55 }
  0x42   :  { %2704 = vmatprep.subr.bf16.mxu0 %v3860_v56 }
  0x44   :  { %305 = vmatmul.mubr.f32.vlgmr.msra.gmra.mrb[0].mxu0 %v232_v2  ;;  %v120_v2 = vld [vmem:[%s4940_s4 + $0x2a0] sm:$0xff] }
  0x45   :  { %2706 = vmatpush1.bf16.msra.mxu0 %v3875_v5  ;;  %310 = vmatprep.mubr.f32.mxu0 %v3727_v57  ;;  %v3967_v16 = vpack.c.bf16 %v122_v7, %v120_v2  ;;  %v149_v2 = vld [vmem:[%s4942_s5 + $0x88] sm:$0xff]  ;;  %v158_v57 = vld [vmem:[%s4942_s5 + $0xd0] sm:$0xff] }
  0x46   :  { %2708 = vmatprep.subr.bf16.mxu0 %v3878_v6  ;;  %v4041_v7 = vpack.c.bf16 %v149_v2, %v148_v61  ;;  %v153_v61 = vld [vmem:[%s4942_s5 + $0xa8] sm:$0xff] }
  0x48   :  { %311 = vmatmul.mubr.f32.gmra.mrb[2].mxu0 %v233_v22  ;;  %v3970_v22 = vpack.c.bf16 %v127_v13, %v125_v12  ;;  %v132_v12 = vld [vmem:[%s4942_s5] sm:$0xff]  ;;  %v133_v13 = vld [vmem:[%s4942_s5 + $0x8] sm:$0xff]  ;;  %2736 = vmatprep.subr.bf16.mxu1 %v4041_v7 }
  0x49   :  { %2710 = vmatpush1.bf16.msra.mxu0 %v3893_v17  ;;  %381 = vmatprep.mubr.f32.mxu0 %v4948_v3  ;;  %v4049_v24 = vpack.c.bf16 %v133_v13, %v132_v12  ;;  %v136_v12 = vld [vmem:[%s4942_s5 + $0x20] sm:$0xff]  ;;  %v137_v13 = vld [vmem:[%s4942_s5 + $0x28] sm:$0xff] }
  0x4a   :  { %2712 = vmatprep.subr.bf16.mxu0 %v3897_v23  ;;  %v4085_v25 = vpack.c.bf16 %v137_v13, %v136_v12  ;;  %v156_v13 = vld [vmem:[%s4942_s5 + $0xc0] sm:$0xff] }
  0x4b   :  { %2738 = vmatpush3.bf16.msra.mxu1 %v4049_v24 }
  0x4c   :  { %2740 = vmatprep.subr.bf16.mxu1 %v4059_v31  ;;  %5114 = vst [vmem:[#allocation39_spill] sm:$0xff] %v4085_v25 }
  0x4d   :  { %2714 = vmatpush1.bf16.msra.mxu0 %v3912_v34 }
  0x4e   :  { %2716 = vmatprep.subr.bf16.mxu0 %v3916_v35 }
  0x51   :  { %2718 = vmatpush1.bf16.msra.mxu0 %v3931_v49 }
  0x52   :  { %2720 = vmatprep.subr.bf16.mxu0 %v3934_v50 }
  0x55   :  { %2722 = vmatpush1.bf16.msra.mxu0 %v3949_v62 }
  0x56   :  { %2724 = vmatprep.subr.bf16.mxu0 %v3952_v63 }
  0x59   :  { %2726 = vmatpush1.bf16.msra.mxu0 %v3967_v16 }
  0x5a   :  { %2728 = vmatprep.subr.bf16.mxu0 %v3970_v22 }
  0x5d   :  { %2730 = vmatpush1.bf16.msra.mxu0 %v3985_v40 }
  0x5e   :  { %2732 = vmatprep.subr.bf16.mxu0 %v3988_v41 }
  0x61   :  { %2734 = vmatpush1.bf16.msra.mxu0 %v3997_v53 }
  0x62   :  { %2832 = vmatprep.subr.bf16.mxu0 %v3563_v4 }
  0x64   :  { %382 = vmatmul.mubr.f32.vlgmr.msra.gmra.mrb[0].mxu0 %v234_v54  ;;  %v4067_v54 = vpack.c.bf16 %v135_v44, %v134_v43  ;;  %v155_v43 = vld [vmem:[%s4942_s5 + $0xb8] sm:$0xff] }
  0x65   :  { %387 = vmatprep.mubr.f32.mxu0 %v4948_v3  ;;  %2834 = vmatpush1.bf16.msra.mxu0 %v3574_v8  ;;  %v4095_v44 = vpack.c.bf16 %v155_v43, %v154_v30  ;;  %v157_v30 = vld [vmem:[%s4942_s5 + $0xc8] sm:$0xff]  ;;  %v140_v3 = vld [vmem:[%s4942_s5 + $0x40] sm:$0xff] }
  0x66   :  { %2836 = vmatprep.subr.bf16.mxu0 %v3576_v9  ;;  %5112 = vst [vmem:[#allocation37_spill] sm:$0xff] %v4067_v54  ;;  %2742 = vmatpush3.bf16.msra.mxu1 %v4067_v54  ;;  %v4113_v43 = vpack.c.bf16 %v157_v30, %v156_v13  ;;  %v159_v13 = vld [vmem:[%s4942_s5 + $0xd8] sm:$0xff] }
  0x67   :  { %5115 = vst [vmem:[#allocation40_spill] sm:$0xff] %v4095_v44  ;;  %v4131_v30 = vpack.c.bf16 %v159_v13, %v158_v57  ;;  %v161_v57 = vld [vmem:[%s4942_s5 + $0xe8] sm:$0xff] }
  0x68   :  { %388 = vmatmul.mubr.f32.gmra.mrb[2].mxu0 %v235_v60  ;;  %v152_v60 = vld [vmem:[%s4942_s5 + $0xa0] sm:$0xff]  ;;  %5117 = vst [vmem:[#allocation42_spill] sm:$0xff] %v4113_v43 }
  0x69   :  { %2838 = vmatpush1.bf16.msra.mxu0 %v3592_v14  ;;  %v4077_v2 = vpack.c.bf16 %v153_v61, %v152_v60  ;;  %v138_v60 = vld [vmem:[%s4942_s5 + $0x30] sm:$0xff]  ;;  %v139_v61 = vld [vmem:[%s4942_s5 + $0x38] sm:$0xff]  ;;  %5119 = vst [vmem:[#allocation44_spill] sm:$0xff] %v4131_v30 }
  0x6a   :  { %2840 = vmatprep.subr.bf16.mxu0 %v3595_v15  ;;  %v4103_v12 = vpack.c.bf16 %v139_v61, %v138_v60  ;;  %v141_v60 = vld [vmem:[%s4942_s5 + $0x48] sm:$0xff] }
  0x6b   :  { %5113 = vst [vmem:[#allocation38_spill] sm:$0xff] %v4077_v2  ;;  %2744 = vmatprep.subr.bf16.mxu1 %v4077_v2  ;;  %v4121_v61 = vpack.c.bf16 %v141_v60, %v140_v3  ;;  %v143_v3 = vld [vmem:[%s4942_s5 + $0x58] sm:$0xff] }
  0x6c   :  { %2746 = vmatpush3.bf16.msra.mxu1 %v4085_v25  ;;  %5116 = vst [vmem:[#allocation41_spill] sm:$0xff] %v4103_v12  ;;  %v4139_v60 = vpack.c.bf16 %v143_v3, %v142_v42  ;;  %v145_v42 = vld [vmem:[%s4942_s5 + $0x68] sm:$0xff] }
  0x6d   :  { %2842 = vmatpush1.bf16.msra.mxu0 %v3610_v20  ;;  %2748 = vmatprep.subr.bf16.mxu1 %v4095_v44  ;;  %5118 = vst [vmem:[#allocation43_spill] sm:$0xff] %v4121_v61 }
  0x6e   :  { %2844 = vmatprep.subr.bf16.mxu0 %v3613_v21  ;;  %5120 = vst [vmem:[#allocation45_spill] sm:$0xff] %v4139_v60 }
  0x70   :  { %2750 = vmatpush3.bf16.msra.mxu1 %v4103_v12 }
  0x71   :  { %2846 = vmatpush1.bf16.msra.mxu0 %v3628_v26  ;;  %2752 = vmatprep.subr.bf16.mxu1 %v4113_v43 }
  0x72   :  { %2848 = vmatprep.subr.bf16.mxu0 %v3631_v27 }
  0x74   :  { %2754 = vmatpush3.bf16.msra.mxu1 %v4121_v61 }
  0x75   :  { %2850 = vmatpush1.bf16.msra.mxu0 %v3646_v32  ;;  %2756 = vmatprep.subr.bf16.mxu1 %v4131_v30 }
  0x76   :  { %2852 = vmatprep.subr.bf16.mxu0 %v3649_v33 }
  0x78   :  { %2758 = vmatpush3.bf16.msra.mxu1 %v4139_v60 }
  0x79   :  { %2854 = vmatpush1.bf16.msra.mxu0 %v3664_v38 }
  0x7a   :  { %2856 = vmatprep.subr.bf16.mxu0 %v3667_v39 }
  0x7d   :  { %2858 = vmatpush1.bf16.msra.mxu0 %v3689_v45 }
  0x7e   :  { %2860 = vmatprep.subr.bf16.mxu0 %v3692_v46 }
  0x81   :  { %2862 = vmatpush1.bf16.msra.mxu0 %v3707_v51 }
  0x82   :  { %2864 = vmatprep.subr.bf16.mxu0 %v3710_v52 }
  0x85   :  { %2866 = vmatpush1.bf16.msra.mxu0 %v3730_v58 }
  0x86   :  { %2868 = vmatprep.subr.bf16.mxu0 %v3734_v59 }
  0x89   :  { %2870 = vmatpush1.bf16.msra.mxu0 %v3749_v0 }
  0x8a   :  { %2872 = vmatprep.subr.bf16.mxu0 %v3752_v1 }
  0x8d   :  { %2874 = vmatpush1.bf16.msra.mxu0 %v3767_v10 }
  0x8e   :  { %2876 = vmatprep.subr.bf16.mxu0 %v3770_v11 }
  0x91   :  { %2878 = vmatpush1.bf16.msra.mxu0 %v3785_v18  ;;  %v238_v18 = vld [vmem:[%s4943_s2 + $0x10] sm:$0xff] }
  0x92   :  { %2880 = vmatprep.subr.bf16.mxu0 %v3788_v19 }
  0x95   :  { %2882 = vmatpush1.bf16.msra.mxu0 %v3803_v28 }
  0x96   :  { %2884 = vmatprep.subr.bf16.mxu0 %v3806_v29 }
  0x99   :  { %2886 = vmatpush1.bf16.msra.mxu0 %v3821_v36 }
  0x9a   :  { %2888 = vmatprep.subr.bf16.mxu0 %v3824_v37  ;;  %v180_v37 = vld [vmem:[%s4942_s5 + $0x180] sm:$0xff] }
  0x9d   :  { %2890 = vmatpush1.bf16.msra.mxu0 %v3839_v47  ;;  %v146_v47 = vld [vmem:[%s4942_s5 + $0x70] sm:$0xff] }
  0x9e   :  { %2892 = vmatprep.subr.bf16.mxu0 %v3842_v48  ;;  %v162_v48 = vld [vmem:[%s4942_s5 + $0xf0] sm:$0xff] }
  0xa1   :  { %2894 = vmatpush1.bf16.msra.mxu0 %v3857_v55  ;;  %v144_v55 = vld [vmem:[%s4942_s5 + $0x60] sm:$0xff] }
  0xa2   :  { %2896 = vmatprep.subr.bf16.mxu0 %v3860_v56  ;;  %v160_v56 = vld [vmem:[%s4942_s5 + $0xe0] sm:$0xff]  ;;  %v4157_v3 = vpack.c.bf16 %v145_v42, %v144_v55  ;;  %v147_v55 = vld [vmem:[%s4942_s5 + $0x78] sm:$0xff] }
  0xa3   :  { %v4149_v13 = vpack.c.bf16 %v161_v57, %v160_v56  ;;  %v163_v56 = vld [vmem:[%s4942_s5 + $0xf8] sm:$0xff]  ;;  %v4175_v42 = vpack.c.bf16 %v147_v55, %v146_v47  ;;  %v236_v47 = vld [vmem:[%s4943_s2] sm:$0xff]  ;;  %v237_v55 = vld [vmem:[%s4943_s2 + $0x8] sm:$0xff] }
  0xa4   :  { %5122 = vst [vmem:[#allocation47_spill] sm:$0xff] %v4157_v3  ;;  %v4167_v57 = vpack.c.bf16 %v163_v56, %v162_v48  ;;  %v181_v48 = vld [vmem:[%s4942_s5 + $0x188] sm:$0xff] }
  0xa5   :  { %5121 = vst [vmem:[#allocation46_spill] sm:$0xff] %v4149_v13  ;;  %2760 = vmatprep.subr.bf16.mxu1 %v4149_v13  ;;  %5124 = vst [vmem:[#allocation49_spill] sm:$0xff] %v4175_v42  ;;  %v4185_v56 = vpack.c.bf16 %v181_v48, %v180_v37  ;;  %v239_v48 = vld [vmem:[%s4943_s2 + $0x18] sm:$0xff] }
  0xa6   :  { %2762 = vmatpush3.bf16.msra.mxu1 %v4157_v3  ;;  %5123 = vst [vmem:[#allocation48_spill] sm:$0xff] %v4167_v57 }
  0xa7   :  { %2764 = vmatprep.subr.bf16.mxu1 %v4167_v57  ;;  %5125 = vst [vmem:[#allocation50_spill] sm:$0xff] %v4185_v56 }
  0xaa   :  { %2766 = vmatpush3.bf16.msra.mxu1 %v4175_v42 }
  0xab   :  { %2768 = vmatprep.subr.bf16.mxu1 %v4185_v56 }
 0x137   :  { %v383_v36 = vpop.f32.mrb[0].mxu0 }
 0x138   :  { %v3407_v29 = vadd.f32 %v383_v36, %v236_v47  ;;  %v385_v28 = vpop.f32.mrb[1].mxu0 }
 0x139   :  { %v3408_v19 = vadd.f32 %v385_v28, %v237_v55 }
 0x13a   :  { %v394_v37 = vsub.f32 0.0, %v3407_v29 }
 0x13b   :  { %v395_v11 = vsub.f32 0.0, %v3408_v19  ;;  %v389_v10 = vpop.f32.mrb[2].mxu0 }
 0x13c   :  { %v398_v1 = vmul.f32 1.442695, %v394_v37  ;;  %v3409_v0 = vadd.f32 %v389_v10, %v238_v18  ;;  %v391_v59 = vpop.f32.mrb[3].mxu0 }
 0x13d   :  { %v400_v58 = vmul.f32 1.442695, %v395_v11  ;;  %v3410_v52 = vadd.f32 %v391_v59, %v239_v48 }
 0x13e   :  { %3440 = vpow2.f32 %v398_v1  ;;  %v396_v36 = vsub.f32 0.0, %v3409_v0 }
 0x13f   :  { %3442 = vpow2.f32 %v400_v58  ;;  %v397_v28 = vsub.f32 0.0, %v3410_v52 }
 0x140   :  { %v402_v47 = vmul.f32 1.442695, %v396_v36 }
 0x141   :  { %v404_v55 = vmul.f32 1.442695, %v397_v28 }
 0x142   :  { %3444 = vpow2.f32 %v402_v47 }
 0x143   :  { %3446 = vpow2.f32 %v404_v55  ;;  %v183_v55 = vld [vmem:[%s4942_s5 + $0x198] sm:$0xff] }
 0x148   :  { %v3441_v51 = vpop.eup %3440 }
 0x149   :  { %v3443_v46 = vpop.eup %3442  ;;  %v406_v45 = vadd.f32 1.0, %v3441_v51 }
 0x14a   :  { %v407_v39 = vadd.f32 1.0, %v3443_v46 }
 0x14b   :  { %3448 = vrcp.f32 %v406_v45 }
 0x14c   :  { %v3445_v38 = vpop.eup %3444  ;;  %3450 = vrcp.f32 %v407_v39 }
 0x14d   :  { %v3447_v37 = vpop.eup %3446  ;;  %v408_v10 = vadd.f32 1.0, %v3445_v38 }
 0x14e   :  { %v409_v18 = vadd.f32 1.0, %v3447_v37 }
 0x14f   :  { %3452 = vrcp.f32 %v408_v10 }
 0x150   :  { %3454 = vrcp.f32 %v409_v18 }
 0x155   :  { %v3449_v59 = vpop.eup %3448 }
 0x156   :  { %v3451_v1 = vpop.eup %3450  ;;  %v4200_v58 = vmul.f32 %v3449_v59, %v3407_v29  ;;  %v166_v59 = vld [vmem:[%s4942_s5 + $0x110] sm:$0xff] }
 0x157   :  { %v419_v11 = vmul.f32 %v3451_v1, %v3408_v19  ;;  %v164_v19 = vld [vmem:[%s4942_s5 + $0x100] sm:$0xff]  ;;  %v167_v1 = vld [vmem:[%s4942_s5 + $0x118] sm:$0xff] }
 0x158   :  { %v427_v48 = vrot.slane %v4200_v58, 7 }
 0x159   :  { %v3453_v36 = vpop.eup %3452  ;;  %v428_v28 = vrot.slane %v419_v11, 7 }
 0x15a   :  { %v3455_v47 = vpop.eup %3454  ;;  %439 = vst [vmem:[#allocation3] sm:$0xfe] %v427_v48  ;;  %v4203_v46 = vmul.f32 %v3453_v36, %v3409_v0  ;;  %v165_v0 = vld [vmem:[%s4942_s5 + $0x108] sm:$0xff]  ;;  %v184_v36 = vld [vmem:[%s4942_s5 + $0x1a0] sm:$0xff] }
 0x15b   :  { %440 = vst [vmem:[#allocation3 + $0x8] sm:$0xfe] %v428_v28  ;;  %v4205_v39 = vmul.f32 %v3455_v47, %v3410_v52  ;;  %v182_v52 = vld [vmem:[%s4942_s5 + $0x190] sm:$0xff]  ;;  %v4227_v37 = vpack.c.bf16 %v165_v0, %v164_v19  ;;  %v4245_v47 = vpack.c.bf16 %v167_v1, %v166_v59  ;;  %v169_v19 = vld [vmem:[%s4942_s5 + $0x128] sm:$0xff]  ;;  %v171_v1 = vld [vmem:[%s4942_s5 + $0x138] sm:$0xff] }
 0x15c   :  { %v429_v38 = vrot.slane %v4203_v46, 7  ;;  %v4229_v18 = vpack.c.bf16 %v183_v55, %v182_v52  ;;  %v186_v0 = vld [vmem:[%s4942_s5 + $0x1b0] sm:$0xff]  ;;  %v187_v52 = vld [vmem:[%s4942_s5 + $0x1b8] sm:$0xff] }
 0x15d   :  { %v431_v45 = vrot.slane %v4205_v39, 7  ;;  %v170_v59 = vld [vmem:[%s4942_s5 + $0x130] sm:$0xff] }
 0x15e   :  { %v4210_v51 = vsel %vm426_vm0, %v427_v48, %v429_v38  ;;  %443 = vst [vmem:[#allocation3 + $0x20] sm:$0x1] %v429_v38 }
 0x15f   :  { %v4219_v29 = vsel %vm426_vm0, %v428_v28, %v431_v45  ;;  %444 = vst [vmem:[#allocation3 + $0x28] sm:$0x1] %v431_v45  ;;  %v185_v28 = vld [vmem:[%s4942_s5 + $0x1a8] sm:$0xff]  ;;  %v168_v45 = vld [vmem:[%s4942_s5 + $0x120] sm:$0xff] }
 0x160   :  { %v4248_v38 = vpack.c.bf16 %v185_v28, %v184_v36  ;;  %v4264_v55 = vpack.c.bf16 %v169_v19, %v168_v45  ;;  %v4282_v36 = vpack.c.bf16 %v171_v1, %v170_v59  ;;  %v172_v45 = vld [vmem:[%s4942_s5 + $0x140] sm:$0xff]  ;;  %v173_v19 = vld [vmem:[%s4942_s5 + $0x148] sm:$0xff] }
 0x161   :  { %v445_v48 = vld [vmem:[#allocation3] sm:$0xff]  ;;  %v4300_v59 = vpack.c.bf16 %v173_v19, %v172_v45  ;;  %v193_v45 = vld [vmem:[%s4942_s5 + $0x1e8] sm:$0xff] }
 0x162   :  { %v446_v10 = vld [vmem:[#allocation3 + $0x8] sm:$0xff]  ;;  %5126 = vst [vmem:[#allocation51_spill] sm:$0xff] %v4264_v55  ;;  %5128 = vst [vmem:[#allocation53_spill] sm:$0xff] %v4282_v36 }
 0x163   :  { %538 = vmatprep.mubr.f32.mxu1 %v446_v10  ;;  %v4267_v10 = vpack.c.bf16 %v187_v52, %v186_v0  ;;  %v190_v0 = vld [vmem:[%s4942_s5 + $0x1d0] sm:$0xff]  ;;  %v191_v52 = vld [vmem:[%s4942_s5 + $0x1d8] sm:$0xff]  ;;  %5130 = vst [vmem:[#allocation55_spill] sm:$0xff] %v4300_v59 }
 0x164   :  { %539 = vmatmul.mubr.f32.vlgmr.msra.gmra.mrb[0].mxu1 %v445_v48  ;;  %v188_v48 = vld [vmem:[%s4942_s5 + $0x1c0] sm:$0xff]  ;;  %v4303_v1 = vpack.c.bf16 %v191_v52, %v190_v0 }
 0x165   :  { %2770 = vmatpush3.bf16.msra.mxu1 %v4227_v37  ;;  %543 = vmatprep.mubr.f32.mxu1 %v4219_v29  ;;  %5127 = vst [vmem:[#allocation52_spill] sm:$0xff] %v4267_v10  ;;  %v176_v52 = vld [vmem:[%s4942_s5 + $0x160] sm:$0xff] }
 0x166   :  { %2772 = vmatprep.subr.bf16.mxu1 %v4229_v18  ;;  %5131 = vst [vmem:[#allocation56_spill] sm:$0xff] %v4303_v1 }
 0x168   :  { %544 = vmatmul.mubr.f32.gmra.mrb[2].mxu1 %v4210_v51 }
 0x169   :  { %2774 = vmatpush3.bf16.msra.mxu1 %v4245_v47  ;;  %613 = vmatprep.mubr.f32.mxu1 %v419_v11  ;;  %v189_v11 = vld [vmem:[%s4942_s5 + $0x1c8] sm:$0xff] }
 0x16a   :  { %2776 = vmatprep.subr.bf16.mxu1 %v4248_v38  ;;  %v4285_v28 = vpack.c.bf16 %v189_v11, %v188_v48  ;;  %v174_v48 = vld [vmem:[%s4942_s5 + $0x150] sm:$0xff]  ;;  %v175_v11 = vld [vmem:[%s4942_s5 + $0x158] sm:$0xff] }
 0x16b   :  { %v4318_v19 = vpack.c.bf16 %v175_v11, %v174_v48  ;;  %v195_v48 = vld [vmem:[%s4942_s5 + $0x1f8] sm:$0xff] }
 0x16c   :  { %5129 = vst [vmem:[#allocation54_spill] sm:$0xff] %v4285_v28 }
 0x16d   :  { %2778 = vmatpush3.bf16.msra.mxu1 %v4264_v55  ;;  %5132 = vst [vmem:[#allocation57_spill] sm:$0xff] %v4318_v19  ;;  %v216_v55 = vld [vmem:[%s4942_s5 + $0x2a0] sm:$0xff] }
 0x16e   :  { %2780 = vmatprep.subr.bf16.mxu1 %v4267_v10  ;;  %v192_v10 = vld [vmem:[%s4942_s5 + $0x1e0] sm:$0xff] }
 0x16f   :  { %v4321_v0 = vpack.c.bf16 %v193_v45, %v192_v10  ;;  %v178_v45 = vld [vmem:[%s4942_s5 + $0x170] sm:$0xff] }
 0x171   :  { %2782 = vmatpush3.bf16.msra.mxu1 %v4282_v36  ;;  %5133 = vst [vmem:[#allocation58_spill] sm:$0xff] %v4321_v0  ;;  %v194_v36 = vld [vmem:[%s4942_s5 + $0x1f0] sm:$0xff] }
 0x172   :  { %2784 = vmatprep.subr.bf16.mxu1 %v4285_v28  ;;  %v177_v28 = vld [vmem:[%s4942_s5 + $0x168] sm:$0xff]  ;;  %v4339_v11 = vpack.c.bf16 %v195_v48, %v194_v36  ;;  %v196_v48 = vld [vmem:[%s4942_s5 + $0x200] sm:$0xff] }
 0x173   :  { %v4336_v10 = vpack.c.bf16 %v177_v28, %v176_v52  ;;  %v213_v28 = vld [vmem:[%s4942_s5 + $0x288] sm:$0xff] }
 0x174   :  { %5135 = vst [vmem:[#allocation60_spill] sm:$0xff] %v4339_v11 }
 0x175   :  { %2786 = vmatpush3.bf16.msra.mxu1 %v4300_v59  ;;  %5134 = vst [vmem:[#allocation59_spill] sm:$0xff] %v4336_v10  ;;  %v212_v59 = vld [vmem:[%s4942_s5 + $0x280] sm:$0xff] }
 0x176   :  { %2788 = vmatprep.subr.bf16.mxu1 %v4303_v1  ;;  %v179_v1 = vld [vmem:[%s4942_s5 + $0x178] sm:$0xff]  ;;  %v4357_v52 = vpack.c.bf16 %v213_v28, %v212_v59 }
 0x177   :  { %v4354_v36 = vpack.c.bf16 %v179_v1, %v178_v45  ;;  %v215_v1 = vld [vmem:[%s4942_s5 + $0x298] sm:$0xff]  ;;  %v450_v45 = vld [vmem:[#allocation3 + $0x8] sm:$0xfc] }
 0x178   :  { %5137 = vst [vmem:[#allocation62_spill] sm:$0xff] %v4357_v52 }
 0x179   :  { %2790 = vmatpush3.bf16.msra.mxu1 %v4318_v19  ;;  %5136 = vst [vmem:[#allocation61_spill] sm:$0xff] %v4354_v36  ;;  %v214_v19 = vld [vmem:[%s4942_s5 + $0x290] sm:$0xff] }
 0x17a   :  { %2792 = vmatprep.subr.bf16.mxu1 %v4321_v0  ;;  %v197_v0 = vld [vmem:[%s4942_s5 + $0x208] sm:$0xff]  ;;  %v4375_v28 = vpack.c.bf16 %v215_v1, %v214_v19  ;;  %v463_v19 = vrot.slane %v450_v45, 2  ;;  %v5020_v1 = vrot.slane %v4219_v29, 2 }
 0x17b   :  { %v4372_v59 = vpack.c.bf16 %v197_v0, %v196_v48  ;;  %v217_v0 = vld [vmem:[%s4942_s5 + $0x2a8] sm:$0xff] }
 0x17c   :  { %5138 = vst [vmem:[#allocation63_spill] sm:$0xff] %v4375_v28 }
 0x17d   :  { %2794 = vmatpush3.bf16.msra.mxu1 %v4336_v10  ;;  %v199_v10 = vld [vmem:[%s4942_s5 + $0x218] sm:$0xff] }
 0x17e   :  { %2796 = vmatprep.subr.bf16.mxu1 %v4339_v11  ;;  %v198_v11 = vld [vmem:[%s4942_s5 + $0x210] sm:$0xff] }
 0x17f   :  { %v4392_v48 = vpack.c.bf16 %v199_v10, %v198_v11  ;;  %v219_v10 = vld [vmem:[%s4942_s5 + $0x2b8] sm:$0xff] }
 0x181   :  { %2798 = vmatpush3.bf16.msra.mxu1 %v4354_v36  ;;  %5139 = vst [vmem:[#allocation64_spill] sm:$0xff] %v4392_v48  ;;  %v200_v36 = vld [vmem:[%s4942_s5 + $0x220] sm:$0xff] }
 0x182   :  { %2800 = vmatprep.subr.bf16.mxu1 %v4357_v52  ;;  %v4396_v52 = vpack.c.bf16 %v217_v0, %v216_v55  ;;  %v465_v55 = vsel %vm459_vm1, %v463_v19, %v5020_v1  ;;  %v202_v0 = vld [vmem:[%s4942_s5 + $0x230] sm:$0xff]  ;;  %v220_v19 = vld [vmem:[%s4942_s5 + $0x2c0] sm:$0xff] }
 0x183   :  { %v222_v1 = vld [vmem:[%s4942_s5 + $0x2d0] sm:$0xff] }
 0x184   :  { %614 = vmatmul.mubr.f32.vlgmr.msra.gmra.mrb[4].mxu1 %v4200_v58  ;;  %5140 = vst [vmem:[#allocation65_spill] sm:$0xff] %v4396_v52  ;;  %v201_v58 = vld [vmem:[%s4942_s5 + $0x228] sm:$0xff] }
 0x185   :  { %618 = vmatprep.mubr.f32.mxu1 %v4205_v39  ;;  %2802 = vmatpush3.bf16.msra.mxu1 %v4372_v59  ;;  %v218_v39 = vld [vmem:[%s4942_s5 + $0x2b0] sm:$0xff]  ;;  %v4415_v11 = vpack.c.bf16 %v201_v58, %v200_v36  ;;  %v221_v36 = vld [vmem:[%s4942_s5 + $0x2c8] sm:$0xff] }
 0x186   :  { %2804 = vmatprep.subr.bf16.mxu1 %v4375_v28  ;;  %v4418_v45 = vpack.c.bf16 %v219_v10, %v218_v39  ;;  %v4436_v39 = vpack.c.bf16 %v221_v36, %v220_v19  ;;  %v204_v10 = vld [vmem:[%s4942_s5 + $0x240] sm:$0xff]  ;;  %v206_v36 = vld [vmem:[%s4942_s5 + $0x250] sm:$0xff] }
 0x187   :  { %5141 = vst [vmem:[#allocation66_spill] sm:$0xff] %v4415_v11 }
 0x188   :  { %619 = vmatmul.mubr.f32.gmra.mrb[6].mxu1 %v4203_v46  ;;  %5142 = vst [vmem:[#allocation67_spill] sm:$0xff] %v4418_v45  ;;  %v203_v46 = vld [vmem:[%s4942_s5 + $0x238] sm:$0xff]  ;;  %5144 = vst [vmem:[#allocation69_spill] sm:$0xff] %v4436_v39 }
 0x189   :  { %2806 = vmatpush3.bf16.msra.mxu1 %v4392_v48  ;;  %688 = vmatprep.mubr.f32.mxu1 %v465_v55  ;;  %v4433_v58 = vpack.c.bf16 %v203_v46, %v202_v0  ;;  %v205_v55 = vld [vmem:[%s4942_s5 + $0x248] sm:$0xff]  ;;  %v223_v0 = vld [vmem:[%s4942_s5 + $0x2d8] sm:$0xff] }
 0x18a   :  { %2808 = vmatprep.subr.bf16.mxu1 %v4396_v52  ;;  %v4451_v46 = vpack.c.bf16 %v205_v55, %v204_v10  ;;  %v4454_v19 = vpack.c.bf16 %v223_v0, %v222_v1  ;;  %v225_v10 = vld [vmem:[%s4942_s5 + $0x2e8] sm:$0xff]  ;;  %v208_v0 = vld [vmem:[%s4942_s5 + $0x260] sm:$0xff] }
 0x18b   :  { %5143 = vst [vmem:[#allocation68_spill] sm:$0xff] %v4433_v58 }
 0x18c   :  { %5145 = vst [vmem:[#allocation70_spill] sm:$0xff] %v4451_v46  ;;  %5146 = vst [vmem:[#allocation71_spill] sm:$0xff] %v4454_v19 }
 0x18d   :  { %2810 = vmatpush3.bf16.msra.mxu1 %v4415_v11  ;;  %v224_v11 = vld [vmem:[%s4942_s5 + $0x2e0] sm:$0xff] }
 0x18e   :  { %2812 = vmatprep.subr.bf16.mxu1 %v4418_v45  ;;  %v207_v45 = vld [vmem:[%s4942_s5 + $0x258] sm:$0xff]  ;;  %v4472_v55 = vpack.c.bf16 %v225_v10, %v224_v11  ;;  %v210_v10 = vld [vmem:[%s4942_s5 + $0x270] sm:$0xff] }
 0x18f   :  { %v4469_v1 = vpack.c.bf16 %v207_v45, %v206_v36  ;;  %v227_v45 = vld [vmem:[%s4942_s5 + $0x2f8] sm:$0xff] }
 0x190   :  { %5148 = vst [vmem:[#allocation73_spill] sm:$0xff] %v4472_v55 }
 0x191   :  { %2814 = vmatpush3.bf16.msra.mxu1 %v4433_v58  ;;  %5147 = vst [vmem:[#allocation72_spill] sm:$0xff] %v4469_v1  ;;  %v226_v58 = vld [vmem:[%s4942_s5 + $0x2f0] sm:$0xff] }
 0x192   :  { %2816 = vmatprep.subr.bf16.mxu1 %v4436_v39  ;;  %v209_v39 = vld [vmem:[%s4942_s5 + $0x268] sm:$0xff]  ;;  %v4490_v36 = vpack.c.bf16 %v227_v45, %v226_v58  ;;  %v451_v58 = vld [vmem:[#allocation3 + $0x20] sm:$0x3]  ;;  %v461_v45 = vrot.slane %v4210_v51, 2 }
 0x193   :  { %v4487_v11 = vpack.c.bf16 %v209_v39, %v208_v0  ;;  %v466_v48 = vrot.slane %v451_v58, 2 }
 0x194   :  { %5150 = vst [vmem:[#allocation75_spill] sm:$0xff] %v4490_v36 }
 0x195   :  { %2818 = vmatpush3.bf16.msra.mxu1 %v4451_v46  ;;  %5149 = vst [vmem:[#allocation74_spill] sm:$0xff] %v4487_v11  ;;  %v449_v46 = vld [vmem:[#allocation3] sm:$0xfc] }
 0x196   :  { %2820 = vmatprep.subr.bf16.mxu1 %v4454_v19  ;;  %v211_v19 = vld [vmem:[%s4942_s5 + $0x278] sm:$0xff]  ;;  %v460_v39 = vrot.slane %v449_v46, 2  ;;  %v467_v46 = vsel %vm459_vm1, %v461_v45, %v466_v48 }
 0x197   :  { %v4499_v52 = vpack.c.bf16 %v211_v19, %v210_v10  ;;  %v4529_v10 = vld [vmem:[%s4944_s3] sm:$0xff] }
 0x198   :  { %5153 = vst [vmem:[#allocation77_spill] sm:$0xff] %v4529_v10 }
 0x199   :  { %2822 = vmatpush3.bf16.msra.mxu1 %v4469_v1  ;;  %5151 = vst [vmem:[#allocation76_spill] sm:$0xff] %v4499_v52  ;;  %v452_v1 = vld [vmem:[#allocation3 + $0x28] sm:$0x3] }
 0x19a   :  { %2824 = vmatprep.subr.bf16.mxu1 %v4472_v55  ;;  %v468_v0 = vrot.slane %v452_v1, 2  ;;  %v462_v55 = vsel %vm459_vm1, %v460_v39, %v461_v45 }
 0x19d   :  { %2826 = vmatpush3.bf16.msra.mxu1 %v4487_v11  ;;  %v5152_v11 = vrot.slane %v4219_v29, 2 }
 0x19e   :  { %2828 = vmatprep.subr.bf16.mxu1 %v4490_v36 }
 0x19f   :  { %v469_v19 = vsel %vm459_vm1, %v5152_v11, %v468_v0 }
 0x1a1   :  { %2830 = vmatpush3.bf16.msra.mxu1 %v4499_v52 }
 0x1a2   :  { %2928 = vmatprep.subr.bf16.mxu1 %v4041_v7 }
 0x1a4   :  { %689 = vmatmul.mubr.f32.vlgmr.msra.gmra.mrb[8].mxu1 %v462_v55 }
 0x1a5   :  { %693 = vmatprep.mubr.f32.mxu1 %v469_v19  ;;  %2930 = vmatpush3.bf16.msra.mxu1 %v4049_v24  ;;  %v4535_v19 = vld [vmem:[%s4944_s3 + $0x8] sm:$0xff] }
 0x1a6   :  { %2932 = vmatprep.subr.bf16.mxu1 %v4059_v31 }
 0x1a8   :  { %694 = vmatmul.mubr.f32.gmra.mrb[10].mxu1 %v467_v46 }
 0x1a9   :  { %2934 = vmatpush3.bf16.msra.mxu1 %v4067_v54 }
 0x1aa   :  { %2936 = vmatprep.subr.bf16.mxu1 %v4077_v2 }
 0x1ad   :  { %2938 = vmatpush3.bf16.msra.mxu1 %v4085_v25 }
 0x1ae   :  { %2940 = vmatprep.subr.bf16.mxu1 %v4095_v44 }
 0x1b1   :  { %2942 = vmatpush3.bf16.msra.mxu1 %v4103_v12 }
 0x1b2   :  { %2944 = vmatprep.subr.bf16.mxu1 %v4113_v43 }
 0x1b5   :  { %2946 = vmatpush3.bf16.msra.mxu1 %v4121_v61 }
 0x1b6   :  { %2948 = vmatprep.subr.bf16.mxu1 %v4131_v30 }
 0x1b9   :  { %2950 = vmatpush3.bf16.msra.mxu1 %v4139_v60 }
 0x1ba   :  { %2952 = vmatprep.subr.bf16.mxu1 %v4149_v13 }
 0x1bd   :  { %2954 = vmatpush3.bf16.msra.mxu1 %v4157_v3 }
 0x1be   :  { %2956 = vmatprep.subr.bf16.mxu1 %v4167_v57 }
 0x1c1   :  { %2958 = vmatpush3.bf16.msra.mxu1 %v4175_v42  ;;  %v707_v42 = vld [vmem:[%s4945_s1] sm:$0xff] }
 0x1c2   :  { %2960 = vmatprep.subr.bf16.mxu1 %v4185_v56 }
 0x237   :  { %v2215_v51 = vpop.f32.mrb[0].mxu1 }
 0x238   :  { %v2216_v29 = vpop.f32.mrb[1].mxu1 }
 0x239   :  { %v2217_v48 = vadd.f32 %v2216_v29, %v2215_v51 }
 0x23b   :  { %v2218_v1 = vpop.f32.mrb[2].mxu1  ;;  %v541_v58 = vadd.f32 %v2217_v48, %v4529_v10 }
 0x23c   :  { %v2219_v55 = vpop.f32.mrb[3].mxu1 }
 0x23d   :  { %v2220_v11 = vadd.f32 %v2219_v55, %v2218_v1 }
 0x23f   :  { %v546_v1 = vadd.f32 %v2220_v11, %v4535_v19 }
 0x257   :  { %v2253_v39 = vpop.f32.mrb[4].mxu1 }
 0x258   :  { %v2254_v0 = vpop.f32.mrb[5].mxu1 }
 0x259   :  { %v2255_v45 = vadd.f32 %v2254_v0, %v2253_v39  ;;  %v709_v39 = vmul.f32 0.05, %v707_v42  ;;  %v708_v0 = vld [vmem:[%s4945_s1 + $0x8] sm:$0xff] }
 0x25b   :  { %v616_v46 = vadd.f32 %v2255_v45, %v541_v58  ;;  %v2256_v51 = vpop.f32.mrb[6].mxu1 }
 0x25c   :  { %v2257_v29 = vpop.f32.mrb[7].mxu1 }
 0x25d   :  { %v2258_v55 = vadd.f32 %v2257_v29, %v2256_v51  ;;  %v710_v51 = vmul.f32 0.05, %v708_v0  ;;  %v5159_v0 = vld [vmem:[#allocation18_spill] sm:$0xff] }
 0x25f   :  { %v621_v56 = vadd.f32 %v2258_v55, %v546_v1  ;;  %v5155_v1 = vld [vmem:[#allocation13_spill] sm:$0xff]  ;;  %v5156_v55 = vld [vmem:[#allocation14_spill] sm:$0xff] }
 0x277   :  { %v2291_v57 = vpop.f32.mrb[8].mxu1 }
 0x278   :  { %v2292_v3 = vpop.f32.mrb[9].mxu1 }
 0x279   :  { %v2293_v48 = vadd.f32 %v2292_v3, %v2291_v57 }
 0x27b   :  { %v4544_v10 = vadd.f32 %v2293_v48, %v616_v46  ;;  %v2294_v58 = vpop.f32.mrb[10].mxu1  ;;  %v5157_v48 = vld [vmem:[#allocation16_spill] sm:$0xff] }
 0x27c   :  { %v2295_v45 = vpop.f32.mrb[11].mxu1 }
 0x27d   :  { %v2296_v13 = vadd.f32 %v2295_v45, %v2294_v58  ;;  %v4547_v11 = vadd.f32 %v709_v39, %v4544_v10  ;;  %v5158_v39 = vld [vmem:[#allocation17_spill] sm:$0xff]  ;;  %v5160_v58 = vld [vmem:[#allocation19_spill] sm:$0xff] }
 0x27e   :  { %v5161_v45 = vld [vmem:[#allocation21_spill] sm:$0xff] }
 0x27f   :  { %v4549_v29 = vadd.f32 %v2296_v13, %v621_v56  ;;  %713 = vst [vmem:[#allocation2 + $0x1] sm:$0xff] %v4547_v11  ;;  %788 = vmatprep.mubr.f32.mxu0 %v4547_v11  ;;  %v5154_v13 = vmov 0.0  }
 0x281   :  { %v4554_v3 = vadd.f32 %v710_v51, %v4549_v29  ;;  %v5162_v51 = vld [vmem:[#allocation22_spill] sm:$0xff] }
 0x283   :  { %714 = vst [vmem:[#allocation2 + $0x9] sm:$0xff] %v4554_v3 }
 0x286   :  { %v715_v57 = vld [vmem:[#allocation2] sm:$0xff] }
 0x287   :  { %789 = vmatmul.mubr.f32.vlgmr.msra.gmra.mrb[4].mxu0 %v715_v57  ;;  %v5163_v57 = vld [vmem:[#allocation23_spill] sm:$0xff] }
 0x288   :  { %2898 = vmatpush1.bf16.msra.mxu0 %v3875_v5  ;;  %794 = vmatprep.mubr.f32.mxu0 %v4554_v3 }
 0x289   :  { %2900 = vmatprep.subr.bf16.mxu0 %v3878_v6 }
 0x28a   :  { %v716_v42 = vld [vmem:[#allocation2 + $0x8] sm:$0xff] }
 0x28b   :  { %795 = vmatmul.mubr.f32.gmra.mrb[6].mxu0 %v716_v42  ;;  %v717_v56 = vld [vmem:[#allocation2 + $0x2] sm:$0xff]  ;;  %v718_v46 = vld [vmem:[#allocation2 + $0xa] sm:$0xff] }
 0x28c   :  { %2902 = vmatpush1.bf16.msra.mxu0 %v3893_v17  ;;  %865 = vmatprep.mubr.f32.mxu0 %v5154_v13  ;;  %v5164_v42 = vld [vmem:[#allocation24_spill] sm:$0xff] }
 0x28d   :  { %2904 = vmatprep.subr.bf16.mxu0 %v3897_v23 }
 0x290   :  { %2906 = vmatpush1.bf16.msra.mxu0 %v3912_v34 }
 0x291   :  { %2908 = vmatprep.subr.bf16.mxu0 %v3916_v35 }
 0x294   :  { %2910 = vmatpush1.bf16.msra.mxu0 %v3931_v49 }
 0x295   :  { %2912 = vmatprep.subr.bf16.mxu0 %v3934_v50 }
 0x298   :  { %2914 = vmatpush1.bf16.msra.mxu0 %v3949_v62 }
 0x299   :  { %2916 = vmatprep.subr.bf16.mxu0 %v3952_v63 }
 0x29c   :  { %2918 = vmatpush1.bf16.msra.mxu0 %v3967_v16 }
 0x29d   :  { %2920 = vmatprep.subr.bf16.mxu0 %v3970_v22 }
 0x2a0   :  { %2922 = vmatpush1.bf16.msra.mxu0 %v3985_v40 }
 0x2a1   :  { %2924 = vmatprep.subr.bf16.mxu0 %v3988_v41 }
 0x2a4   :  { %2926 = vmatpush1.bf16.msra.mxu0 %v3997_v53 }
 0x2a5   :  { %3024 = vmatprep.subr.bf16.mxu0 %v3563_v4 }
 0x2a7   :  { %866 = vmatmul.mubr.f32.vlgmr.msra.gmra.mrb[4].mxu0 %v717_v56  ;;  %v5165_v56 = vld [vmem:[#allocation25_spill] sm:$0xff] }
 0x2a8   :  { %871 = vmatprep.mubr.f32.mxu0 %v5154_v13  ;;  %3026 = vmatpush1.bf16.msra.mxu0 %v3574_v8 }
 0x2a9   :  { %3028 = vmatprep.subr.bf16.mxu0 %v3576_v9 }
 0x2ab   :  { %872 = vmatmul.mubr.f32.gmra.mrb[6].mxu0 %v718_v46  ;;  %v5166_v46 = vld [vmem:[#allocation26_spill] sm:$0xff] }
 0x2ac   :  { %3030 = vmatpush1.bf16.msra.mxu0 %v3592_v14 }
 0x2ad   :  { %3032 = vmatprep.subr.bf16.mxu0 %v3595_v15 }
 0x2b0   :  { %3034 = vmatpush1.bf16.msra.mxu0 %v3610_v20 }
 0x2b1   :  { %3036 = vmatprep.subr.bf16.mxu0 %v3613_v21 }
 0x2b4   :  { %3038 = vmatpush1.bf16.msra.mxu0 %v3628_v26 }
 0x2b5   :  { %3040 = vmatprep.subr.bf16.mxu0 %v3631_v27 }
 0x2b8   :  { %3042 = vmatpush1.bf16.msra.mxu0 %v3646_v32 }
 0x2b9   :  { %3044 = vmatprep.subr.bf16.mxu0 %v3649_v33 }
 0x2bc   :  { %3046 = vmatpush1.bf16.msra.mxu0 %v5155_v1 }
 0x2bd   :  { %3048 = vmatprep.subr.bf16.mxu0 %v5156_v55  ;;  %v5167_v55 = vld [vmem:[#allocation27_spill] sm:$0xff] }
 0x2c0   :  { %3050 = vmatpush1.bf16.msra.mxu0 %v5157_v48  ;;  %v5168_v48 = vld [vmem:[#allocation28_spill] sm:$0xff] }
 0x2c1   :  { %3052 = vmatprep.subr.bf16.mxu0 %v5158_v39  ;;  %v5169_v39 = vld [vmem:[#allocation29_spill] sm:$0xff] }
 0x2c4   :  { %3054 = vmatpush1.bf16.msra.mxu0 %v5159_v0  ;;  %v5170_v0 = vld [vmem:[#allocation30_spill] sm:$0xff] }
 0x2c5   :  { %3056 = vmatprep.subr.bf16.mxu0 %v5160_v58  ;;  %v5171_v58 = vld [vmem:[#allocation31_spill] sm:$0xff] }
 0x2c8   :  { %3058 = vmatpush1.bf16.msra.mxu0 %v5161_v45  ;;  %v5172_v45 = vld [vmem:[#allocation32_spill] sm:$0xff] }
 0x2c9   :  { %3060 = vmatprep.subr.bf16.mxu0 %v5162_v51  ;;  %v5173_v51 = vld [vmem:[#allocation33_spill] sm:$0xff] }
 0x2cc   :  { %3062 = vmatpush1.bf16.msra.mxu0 %v5163_v57  ;;  %v5174_v57 = vld [vmem:[#allocation34_spill] sm:$0xff] }
 0x2cd   :  { %3064 = vmatprep.subr.bf16.mxu0 %v5164_v42  ;;  %v5175_v42 = vld [vmem:[#allocation35_spill] sm:$0xff] }
 0x2d0   :  { %3066 = vmatpush1.bf16.msra.mxu0 %v5165_v56  ;;  %v5176_v56 = vld [vmem:[#allocation36_spill] sm:$0xff] }
 0x2d1   :  { %3068 = vmatprep.subr.bf16.mxu0 %v5166_v46 }
 0x2d4   :  { %3070 = vmatpush1.bf16.msra.mxu0 %v5167_v55 }
 0x2d5   :  { %3072 = vmatprep.subr.bf16.mxu0 %v5168_v48  ;;  %v2167_v48 = vld [vmem:[%s4943_s2 + $0x20] sm:$0xff] }
 0x2d8   :  { %3074 = vmatpush1.bf16.msra.mxu0 %v5169_v39 }
 0x2d9   :  { %3076 = vmatprep.subr.bf16.mxu0 %v5170_v0  ;;  %v2168_v0 = vld [vmem:[%s4943_s2 + $0x28] sm:$0xff] }
 0x2dc   :  { %3078 = vmatpush1.bf16.msra.mxu0 %v5171_v58 }
 0x2dd   :  { %3080 = vmatprep.subr.bf16.mxu0 %v5172_v45 }
 0x2e0   :  { %3082 = vmatpush1.bf16.msra.mxu0 %v5173_v51 }
 0x2e1   :  { %3084 = vmatprep.subr.bf16.mxu0 %v5174_v57  ;;  %v2169_v57 = vld [vmem:[%s4943_s2 + $0x30] sm:$0xff] }
 0x2e4   :  { %3086 = vmatpush1.bf16.msra.mxu0 %v5175_v42 }
 0x2e5   :  { %3088 = vmatprep.subr.bf16.mxu0 %v5176_v56  ;;  %v2170_v56 = vld [vmem:[%s4943_s2 + $0x38] sm:$0xff] }
 0x37a   :  { %v867_v39 = vpop.f32.mrb[4].mxu0 }
 0x37b   :  { %v3411_v58 = vadd.f32 %v2167_v48, %v867_v39  ;;  %v869_v55 = vpop.f32.mrb[5].mxu0 }
 0x37c   :  { %v3412_v45 = vadd.f32 %v2168_v0, %v869_v55 }
 0x37d   :  { %v878_v51 = vsub.f32 0.0, %v3411_v58 }
 0x37e   :  { %v879_v42 = vsub.f32 0.0, %v3412_v45  ;;  %v873_v46 = vpop.f32.mrb[6].mxu0 }
 0x37f   :  { %v882_v1 = vmul.f32 1.442695, %v878_v51  ;;  %v3413_v33 = vadd.f32 %v2169_v57, %v873_v46  ;;  %v875_v32 = vpop.f32.mrb[7].mxu0 }
 0x380   :  { %v884_v27 = vmul.f32 1.442695, %v879_v42  ;;  %v3414_v26 = vadd.f32 %v2170_v56, %v875_v32 }
 0x381   :  { %3456 = vpow2.f32 %v882_v1  ;;  %v880_v48 = vsub.f32 0.0, %v3413_v33 }
 0x382   :  { %3458 = vpow2.f32 %v884_v27  ;;  %v881_v55 = vsub.f32 0.0, %v3414_v26 }
 0x383   :  { %v886_v39 = vmul.f32 1.442695, %v880_v48 }
 0x384   :  { %v888_v0 = vmul.f32 1.442695, %v881_v55 }
 0x385   :  { %3460 = vpow2.f32 %v886_v39 }
 0x386   :  { %3462 = vpow2.f32 %v888_v0 }
 0x38b   :  { %v3457_v21 = vpop.eup %3456 }
 0x38c   :  { %v3459_v20 = vpop.eup %3458  ;;  %v890_v15 = vadd.f32 1.0, %v3457_v21 }
 0x38d   :  { %v891_v14 = vadd.f32 1.0, %v3459_v20 }
 0x38e   :  { %3464 = vrcp.f32 %v890_v15 }
 0x38f   :  { %v3461_v9 = vpop.eup %3460  ;;  %3466 = vrcp.f32 %v891_v14 }
 0x390   :  { %v3463_v51 = vpop.eup %3462  ;;  %v892_v57 = vadd.f32 1.0, %v3461_v9 }
 0x391   :  { %v893_v46 = vadd.f32 1.0, %v3463_v51 }
 0x392   :  { %3468 = vrcp.f32 %v892_v57  ;;  %v5180_v57 = vld [vmem:[#allocation54_spill] sm:$0xff] }
 0x393   :  { %3470 = vrcp.f32 %v893_v46  ;;  %v5181_v46 = vld [vmem:[#allocation55_spill] sm:$0xff] }
 0x398   :  { %v3465_v32 = vpop.eup %3464 }
 0x399   :  { %v3467_v1 = vpop.eup %3466  ;;  %v902_v27 = vmul.f32 %v3465_v32, %v3411_v58  ;;  %v5182_v32 = vld [vmem:[#allocation56_spill] sm:$0xff] }
 0x39a   :  { %v903_v42 = vmul.f32 %v3467_v1, %v3412_v45  ;;  %v5179_v45 = vld [vmem:[#allocation53_spill] sm:$0xff] }
 0x39b   :  { %v910_v56 = vrot.slane %v902_v27, 7  ;;  %v5183_v1 = vld [vmem:[#allocation57_spill] sm:$0xff] }
 0x39c   :  { %v3469_v48 = vpop.eup %3468  ;;  %v911_v55 = vrot.slane %v903_v42, 7 }
 0x39d   :  { %v3471_v39 = vpop.eup %3470  ;;  %922 = vst [vmem:[#allocation3] sm:$0xfe] %v910_v56  ;;  %v904_v0 = vmul.f32 %v3469_v48, %v3413_v33  ;;  %v5178_v33 = vld [vmem:[#allocation52_spill] sm:$0xff]  ;;  %v5185_v48 = vld [vmem:[#allocation59_spill] sm:$0xff] }
 0x39e   :  { %923 = vst [vmem:[#allocation3 + $0x8] sm:$0xfe] %v911_v55  ;;  %v905_v20 = vmul.f32 %v3471_v39, %v3414_v26  ;;  %v5177_v26 = vld [vmem:[#allocation51_spill] sm:$0xff] }
 0x39f   :  { %v912_v15 = vrot.slane %v904_v0, 7 }
 0x3a0   :  { %v914_v21 = vrot.slane %v905_v20, 7 }
 0x3a1   :  { %v4621_v14 = vsel %vm426_vm0, %v910_v56, %v912_v15  ;;  %926 = vst [vmem:[#allocation3 + $0x20] sm:$0x1] %v912_v15  ;;  %v5184_v56 = vld [vmem:[#allocation58_spill] sm:$0xff] }
 0x3a2   :  { %v915_v9 = vsel %vm426_vm0, %v911_v55, %v914_v21  ;;  %927 = vst [vmem:[#allocation3 + $0x28] sm:$0x1] %v914_v21  ;;  %v5187_v55 = vld [vmem:[#allocation61_spill] sm:$0xff]  ;;  %v5188_v15 = vld [vmem:[#allocation62_spill] sm:$0xff] }
 0x3a4   :  { %v928_v58 = vld [vmem:[#allocation3] sm:$0xff] }
 0x3a5   :  { %v929_v51 = vld [vmem:[#allocation3 + $0x8] sm:$0xff] }
 0x3a6   :  { %1020 = vmatprep.mubr.f32.mxu1 %v929_v51  ;;  %v933_v39 = vld [vmem:[#allocation3 + $0x8] sm:$0xfc]  ;;  %v946_v51 = vrot.slane %v915_v9, 2 }
 0x3a7   :  { %1021 = vmatmul.mubr.f32.vlgmr.msra.gmra.mrb[12].mxu1 %v928_v58  ;;  %v945_v21 = vrot.slane %v933_v39, 2  ;;  %v5195_v39 = vld [vmem:[#allocation70_spill] sm:$0xff] }
 0x3a8   :  { %2962 = vmatpush3.bf16.msra.mxu1 %v4227_v37  ;;  %1025 = vmatprep.mubr.f32.mxu1 %v915_v9  ;;  %v5196_v9 = vld [vmem:[#allocation71_spill] sm:$0xff] }
 0x3a9   :  { %2964 = vmatprep.subr.bf16.mxu1 %v4229_v18  ;;  %v947_v58 = vsel %vm459_vm1, %v945_v21, %v946_v51  ;;  %v5198_v21 = vld [vmem:[#allocation73_spill] sm:$0xff] }
 0x3ab   :  { %1026 = vmatmul.mubr.f32.gmra.mrb[14].mxu1 %v4621_v14 }
 0x3ac   :  { %2966 = vmatpush3.bf16.msra.mxu1 %v4245_v47  ;;  %1095 = vmatprep.mubr.f32.mxu1 %v903_v42  ;;  %v5186_v42 = vld [vmem:[#allocation60_spill] sm:$0xff] }
 0x3ad   :  { %2968 = vmatprep.subr.bf16.mxu1 %v4248_v38 }
 0x3b0   :  { %2970 = vmatpush3.bf16.msra.mxu1 %v5177_v26 }
 0x3b1   :  { %2972 = vmatprep.subr.bf16.mxu1 %v5178_v33 }
 0x3b4   :  { %2974 = vmatpush3.bf16.msra.mxu1 %v5179_v45 }
 0x3b5   :  { %2976 = vmatprep.subr.bf16.mxu1 %v5180_v57 }
 0x3b8   :  { %2978 = vmatpush3.bf16.msra.mxu1 %v5181_v46 }
 0x3b9   :  { %2980 = vmatprep.subr.bf16.mxu1 %v5182_v32 }
 0x3bc   :  { %2982 = vmatpush3.bf16.msra.mxu1 %v5183_v1 }
 0x3bd   :  { %2984 = vmatprep.subr.bf16.mxu1 %v5184_v56  ;;  %v5189_v56 = vld [vmem:[#allocation64_spill] sm:$0xff] }
 0x3c0   :  { %2986 = vmatpush3.bf16.msra.mxu1 %v5185_v48  ;;  %v5192_v48 = vld [vmem:[#allocation67_spill] sm:$0xff] }
 0x3c1   :  { %2988 = vmatprep.subr.bf16.mxu1 %v5186_v42  ;;  %v5190_v42 = vld [vmem:[#allocation65_spill] sm:$0xff] }
 0x3c4   :  { %2990 = vmatpush3.bf16.msra.mxu1 %v5187_v55  ;;  %v5191_v55 = vld [vmem:[#allocation66_spill] sm:$0xff] }
 0x3c5   :  { %2992 = vmatprep.subr.bf16.mxu1 %v5188_v15 }
 0x3c7   :  { %1096 = vmatmul.mubr.f32.vlgmr.msra.gmra.mrb[16].mxu1 %v902_v27  ;;  %v5193_v27 = vld [vmem:[#allocation68_spill] sm:$0xff] }
 0x3c8   :  { %1100 = vmatprep.mubr.f32.mxu1 %v905_v20  ;;  %2994 = vmatpush3.bf16.msra.mxu1 %v4372_v59  ;;  %v5194_v20 = vld [vmem:[#allocation69_spill] sm:$0xff] }
 0x3c9   :  { %2996 = vmatprep.subr.bf16.mxu1 %v4375_v28  ;;  %v934_v28 = vld [vmem:[#allocation3 + $0x20] sm:$0x3] }
 0x3cb   :  { %1101 = vmatmul.mubr.f32.gmra.mrb[18].mxu1 %v904_v0  ;;  %v5197_v0 = vld [vmem:[#allocation72_spill] sm:$0xff] }
 0x3cc   :  { %2998 = vmatpush3.bf16.msra.mxu1 %v5189_v56  ;;  %1170 = vmatprep.mubr.f32.mxu1 %v947_v58  ;;  %v932_v56 = vld [vmem:[#allocation3] sm:$0xfc] }
 0x3cd   :  { %3000 = vmatprep.subr.bf16.mxu1 %v5190_v42  ;;  %v5199_v58 = vld [vmem:[#allocation74_spill] sm:$0xff]  ;;  %v935_v42 = vld [vmem:[#allocation3 + $0x28] sm:$0x3] }
 0x3d0   :  { %3002 = vmatpush3.bf16.msra.mxu1 %v5191_v55  ;;  %v942_v55 = vrot.slane %v932_v56, 2 }
 0x3d1   :  { %3004 = vmatprep.subr.bf16.mxu1 %v5192_v48  ;;  %v950_v48 = vrot.slane %v935_v42, 2  ;;  %v5203_v42 = vld [vmem:[#allocation49_spill] sm:$0xff] }
 0x3d4   :  { %3006 = vmatpush3.bf16.msra.mxu1 %v5193_v27  ;;  %v943_v27 = vrot.slane %v4621_v14, 2  ;;  %v5201_v14 = vld [vmem:[#allocation47_spill] sm:$0xff] }
 0x3d5   :  { %3008 = vmatprep.subr.bf16.mxu1 %v5194_v20 }
 0x3d8   :  { %3010 = vmatpush3.bf16.msra.mxu1 %v5195_v39 }
 0x3d9   :  { %3012 = vmatprep.subr.bf16.mxu1 %v5196_v9  ;;  %v944_v9 = vsel %vm459_vm1, %v942_v55, %v943_v27  ;;  %v5204_v55 = vld [vmem:[#allocation50_spill] sm:$0xff] }
 0x3dc   :  { %3014 = vmatpush3.bf16.msra.mxu1 %v5197_v0  ;;  %v948_v0 = vrot.slane %v934_v28, 2  ;;  %v5200_v28 = vld [vmem:[#allocation46_spill] sm:$0xff] }
 0x3dd   :  { %3016 = vmatprep.subr.bf16.mxu1 %v5198_v21  ;;  %v951_v21 = vsel %vm459_vm1, %v946_v51, %v950_v48  ;;  %v5202_v48 = vld [vmem:[#allocation48_spill] sm:$0xff] }
 0x3de   :  { %v949_v56 = vsel %vm459_vm1, %v943_v27, %v948_v0 }
 0x3e0   :  { %3018 = vmatpush3.bf16.msra.mxu1 %v5199_v58 }
 0x3e1   :  { %3020 = vmatprep.subr.bf16.mxu1 %v4490_v36 }
 0x3e4   :  { %3022 = vmatpush3.bf16.msra.mxu1 %v4499_v52 }
 0x3e5   :  { %3120 = vmatprep.subr.bf16.mxu1 %v4041_v7 }
 0x3e7   :  { %1171 = vmatmul.mubr.f32.vlgmr.msra.gmra.mrb[20].mxu1 %v944_v9 }
 0x3e8   :  { %1175 = vmatprep.mubr.f32.mxu1 %v951_v21  ;;  %3122 = vmatpush3.bf16.msra.mxu1 %v4049_v24 }
 0x3e9   :  { %3124 = vmatprep.subr.bf16.mxu1 %v4059_v31 }
 0x3eb   :  { %1176 = vmatmul.mubr.f32.gmra.mrb[22].mxu1 %v949_v56 }
 0x3ec   :  { %3126 = vmatpush3.bf16.msra.mxu1 %v4067_v54 }
 0x3ed   :  { %3128 = vmatprep.subr.bf16.mxu1 %v4077_v2 }
 0x3f0   :  { %3130 = vmatpush3.bf16.msra.mxu1 %v4085_v25 }
 0x3f1   :  { %3132 = vmatprep.subr.bf16.mxu1 %v4095_v44 }
 0x3f4   :  { %3134 = vmatpush3.bf16.msra.mxu1 %v4103_v12 }
 0x3f5   :  { %3136 = vmatprep.subr.bf16.mxu1 %v4113_v43  ;;  %v5205_v43 = vld [vmem:[#allocation77_spill] sm:$0xff] }
 0x3f8   :  { %3138 = vmatpush3.bf16.msra.mxu1 %v4121_v61 }
 0x3f9   :  { %3140 = vmatprep.subr.bf16.mxu1 %v4131_v30 }
 0x3fc   :  { %3142 = vmatpush3.bf16.msra.mxu1 %v4139_v60 }
 0x3fd   :  { %3144 = vmatprep.subr.bf16.mxu1 %v5200_v28 }
 0x400   :  { %3146 = vmatpush3.bf16.msra.mxu1 %v5201_v14 }
 0x401   :  { %3148 = vmatprep.subr.bf16.mxu1 %v5202_v48 }
 0x404   :  { %3150 = vmatpush3.bf16.msra.mxu1 %v5203_v42 }
 0x405   :  { %3152 = vmatprep.subr.bf16.mxu1 %v5204_v55  ;;  %v2171_v55 = vld [vmem:[%s4945_s1 + $0x10] sm:$0xff] }
 0x406   :  { %v1192_v54 = vmul.f32 0.05, %v2171_v55 }
 0x47a   :  { %v2329_v51 = vpop.f32.mrb[12].mxu1 }
 0x47b   :  { %v2330_v27 = vpop.f32.mrb[13].mxu1 }
 0x47c   :  { %v2331_v9 = vadd.f32 %v2330_v27, %v2329_v51  ;;  %v5206_v27 = vld [vmem:[#allocation15_spill] sm:$0xff] }
 0x47e   :  { %v2332_v0 = vpop.f32.mrb[14].mxu1  ;;  %v1023_v60 = vadd.f32 %v2331_v9, %v5205_v43 }
 0x47f   :  { %v2333_v21 = vpop.f32.mrb[15].mxu1 }
 0x480   :  { %v2334_v56 = vadd.f32 %v2333_v21, %v2332_v0  ;;  %v699_v0 = vsub.f32 %v4544_v10, %v5206_v27 }
 0x482   :  { %v1028_v48 = vadd.f32 %v2334_v56, %v4535_v19 }
 0x49a   :  { %v2367_v61 = vpop.f32.mrb[16].mxu1 }
 0x49b   :  { %v2368_v30 = vpop.f32.mrb[17].mxu1 }
 0x49c   :  { %v2369_v12 = vadd.f32 %v2368_v30, %v2367_v61 }
 0x49e   :  { %v1098_v28 = vadd.f32 %v2369_v12, %v1023_v60  ;;  %v2370_v44 = vpop.f32.mrb[18].mxu1  ;;  %v2172_v12 = vld [vmem:[%s4945_s1 + $0x18] sm:$0xff]  ;;  %v701_v60 = vmul.f32 %v699_v0, %v699_v0 }
 0x49f   :  { %v2371_v14 = vpop.f32.mrb[19].mxu1  ;;  %v1193_v10 = vmul.f32 0.05, %v2172_v12 }
 0x4a0   :  { %v2372_v25 = vadd.f32 %v2371_v14, %v2370_v44  ;;  %v5207_v44 = vld [vmem:[#allocation20_spill] sm:$0xff]  ;;  %v703_v55 = vmul.f32 4.0, %v701_v60 }
 0x4a1   :  { %v5208_v60 = vld [vmem:[#allocation4_spill] sm:$0xff] }
 0x4a2   :  { %v1103_v42 = vadd.f32 %v2372_v25, %v1028_v48  ;;  %v700_v25 = vsub.f32 %v4549_v29, %v5207_v44 }
 0x4ba   :  { %v2405_v51 = vpop.f32.mrb[20].mxu1 }
 0x4bb   :  { %v2406_v21 = vpop.f32.mrb[21].mxu1 }
 0x4bc   :  { %v2407_v2 = vadd.f32 %v2406_v21, %v2405_v51 }
 0x4be   :  { %v1173_v61 = vadd.f32 %v2407_v2, %v1098_v28  ;;  %v2408_v30 = vpop.f32.mrb[22].mxu1  ;;  %v702_v2 = vmul.f32 %v700_v25, %v700_v25  ;;  %v5209_v25 = vld [vmem:[#allocation5_spill] sm:$0xff] }
 0x4bf   :  { %v2409_v14 = vpop.f32.mrb[23].mxu1 }
 0x4c0   :  { %v1181_v48 = vsub.f32 %v1173_v61, %v4547_v11  ;;  %v2410_v9 = vadd.f32 %v2409_v14, %v2408_v30  ;;  %v4691_v56 = vadd.f32 %v1192_v54, %v1173_v61  ;;  %v704_v54 = vmul.f32 4.0, %v702_v2  ;;  %v5210_v14 = vld [vmem:[#allocation6_spill] sm:$0xff]  ;;  %v5219_v2 = vld [vmem:[#allocation16_spill] sm:$0xff] }
 0x4c2   :  { %v1183_v27 = vmul.f32 %v1181_v48, %v1181_v48  ;;  %v1178_v51 = vadd.f32 %v2410_v9, %v1103_v42  ;;  %1196 = vst [vmem:[#allocation2 + $0x1] sm:$0xff] %v4691_v56  ;;  %1271 = vmatprep.mubr.f32.mxu0 %v4691_v56  ;;  %v5211_v48 = vld [vmem:[#allocation7_spill] sm:$0xff]  ;;  %v5212_v9 = vld [vmem:[#allocation8_spill] sm:$0xff] }
 0x4c4   :  { %v1185_v28 = vmul.f32 4.0, %v1183_v27  ;;  %v1182_v0 = vsub.f32 %v1178_v51, %v4554_v3  ;;  %v4696_v21 = vadd.f32 %v1193_v10, %v1178_v51  ;;  %v5213_v10 = vld [vmem:[#allocation9_spill] sm:$0xff]  ;;  %v5215_v27 = vld [vmem:[#allocation11_spill] sm:$0xff]  ;;  %v5216_v51 = vld [vmem:[#allocation12_spill] sm:$0xff] }
 0x4c6   :  { %v4698_v29 = vadd.f32 %v1185_v28, %v703_v55  ;;  %v1184_v11 = vmul.f32 %v1182_v0, %v1182_v0  ;;  %1197 = vst [vmem:[#allocation2 + $0x9] sm:$0xff] %v4696_v21  ;;  %v5218_v55 = vld [vmem:[#allocation14_spill] sm:$0xff]  ;;  %v5220_v28 = vld [vmem:[#allocation17_spill] sm:$0xff] }
 0x4c7   :  { %v5221_v0 = vld [vmem:[#allocation18_spill] sm:$0xff] }
 0x4c8   :  { %v1186_v12 = vmul.f32 4.0, %v1184_v11  ;;  %v5222_v11 = vld [vmem:[#allocation19_spill] sm:$0xff] }
 0x4c9   :  { %v1198_v61 = vld [vmem:[#allocation2] sm:$0xff] }
 0x4ca   :  { %v4701_v42 = vadd.f32 %v1186_v12, %v704_v54  ;;  %1272 = vmatmul.mubr.f32.vlgmr.msra.gmra.mrb[8].mxu0 %v1198_v61  ;;  %v5223_v54 = vld [vmem:[#allocation21_spill] sm:$0xff]  ;;  %v5224_v12 = vld [vmem:[#allocation22_spill] sm:$0xff]  ;;  %v5225_v61 = vld [vmem:[#allocation23_spill] sm:$0xff] }
 0x4cb   :  { %3090 = vmatpush1.bf16.msra.mxu0 %v3875_v5  ;;  %1277 = vmatprep.mubr.f32.mxu0 %v4696_v21 }
 0x4cc   :  { %3092 = vmatprep.subr.bf16.mxu0 %v3878_v6 }
 0x4cd   :  { %v1199_v3 = vld [vmem:[#allocation2 + $0x8] sm:$0xff] }
 0x4ce   :  { %1278 = vmatmul.mubr.f32.gmra.mrb[10].mxu0 %v1199_v3  ;;  %v1200_v30 = vld [vmem:[#allocation2 + $0x2] sm:$0xff]  ;;  %v1201_v44 = vld [vmem:[#allocation2 + $0xa] sm:$0xff] }
 0x4cf   :  { %3094 = vmatpush1.bf16.msra.mxu0 %v3893_v17  ;;  %1348 = vmatprep.mubr.f32.mxu0 %v5154_v13  ;;  %v5226_v3 = vld [vmem:[#allocation24_spill] sm:$0xff] }
 0x4d0   :  { %3096 = vmatprep.subr.bf16.mxu0 %v3897_v23 }
 0x4d3   :  { %3098 = vmatpush1.bf16.msra.mxu0 %v3912_v34 }
 0x4d4   :  { %3100 = vmatprep.subr.bf16.mxu0 %v3916_v35 }
 0x4d7   :  { %3102 = vmatpush1.bf16.msra.mxu0 %v3931_v49 }
 0x4d8   :  { %3104 = vmatprep.subr.bf16.mxu0 %v3934_v50 }
 0x4db   :  { %3106 = vmatpush1.bf16.msra.mxu0 %v3949_v62 }
 0x4dc   :  { %3108 = vmatprep.subr.bf16.mxu0 %v3952_v63 }
 0x4df   :  { %3110 = vmatpush1.bf16.msra.mxu0 %v3967_v16 }
 0x4e0   :  { %3112 = vmatprep.subr.bf16.mxu0 %v3970_v22 }
 0x4e3   :  { %3114 = vmatpush1.bf16.msra.mxu0 %v3985_v40 }
 0x4e4   :  { %3116 = vmatprep.subr.bf16.mxu0 %v3988_v41 }
 0x4e7   :  { %3118 = vmatpush1.bf16.msra.mxu0 %v3997_v53 }
 0x4e8   :  { %3216 = vmatprep.subr.bf16.mxu0 %v3563_v4  ;;  %v5214_v4 = vld [vmem:[#allocation10_spill] sm:$0xff] }
 0x4ea   :  { %1349 = vmatmul.mubr.f32.vlgmr.msra.gmra.mrb[8].mxu0 %v1200_v30  ;;  %v5227_v30 = vld [vmem:[#allocation25_spill] sm:$0xff] }
 0x4eb   :  { %1354 = vmatprep.mubr.f32.mxu0 %v5154_v13  ;;  %3218 = vmatpush1.bf16.msra.mxu0 %v3574_v8  ;;  %v5217_v8 = vld [vmem:[#allocation13_spill] sm:$0xff] }
 0x4ec   :  { %3220 = vmatprep.subr.bf16.mxu0 %v5208_v60  ;;  %v5228_v60 = vld [vmem:[#allocation26_spill] sm:$0xff] }
 0x4ee   :  { %1355 = vmatmul.mubr.f32.gmra.mrb[10].mxu0 %v1201_v44  ;;  %v5229_v44 = vld [vmem:[#allocation27_spill] sm:$0xff] }
 0x4ef   :  { %3222 = vmatpush1.bf16.msra.mxu0 %v5209_v25  ;;  %v5230_v25 = vld [vmem:[#allocation28_spill] sm:$0xff] }
 0x4f0   :  { %3224 = vmatprep.subr.bf16.mxu0 %v5210_v14  ;;  %v5231_v14 = vld [vmem:[#allocation29_spill] sm:$0xff] }
 0x4f3   :  { %3226 = vmatpush1.bf16.msra.mxu0 %v5211_v48  ;;  %v5232_v48 = vld [vmem:[#allocation30_spill] sm:$0xff] }
 0x4f4   :  { %3228 = vmatprep.subr.bf16.mxu0 %v5212_v9  ;;  %v5233_v9 = vld [vmem:[#allocation31_spill] sm:$0xff] }
 0x4f7   :  { %3230 = vmatpush1.bf16.msra.mxu0 %v5213_v10  ;;  %v5234_v10 = vld [vmem:[#allocation32_spill] sm:$0xff] }
 0x4f8   :  { %3232 = vmatprep.subr.bf16.mxu0 %v5214_v4  ;;  %v5235_v4 = vld [vmem:[#allocation33_spill] sm:$0xff] }
 0x4fb   :  { %3234 = vmatpush1.bf16.msra.mxu0 %v5215_v27  ;;  %v5236_v27 = vld [vmem:[#allocation34_spill] sm:$0xff] }
 0x4fc   :  { %3236 = vmatprep.subr.bf16.mxu0 %v5216_v51  ;;  %v5237_v51 = vld [vmem:[#allocation35_spill] sm:$0xff] }
 0x4ff   :  { %3238 = vmatpush1.bf16.msra.mxu0 %v5217_v8  ;;  %v5238_v8 = vld [vmem:[#allocation36_spill] sm:$0xff] }
 0x500   :  { %3240 = vmatprep.subr.bf16.mxu0 %v5218_v55  ;;  %v2173_v55 = vld [vmem:[%s4943_s2 + $0x40] sm:$0xff] }
 0x503   :  { %3242 = vmatpush1.bf16.msra.mxu0 %v5219_v2  ;;  %v2174_v2 = vld [vmem:[%s4943_s2 + $0x48] sm:$0xff] }
 0x504   :  { %3244 = vmatprep.subr.bf16.mxu0 %v5220_v28 }
 0x507   :  { %3246 = vmatpush1.bf16.msra.mxu0 %v5221_v0 }
 0x508   :  { %3248 = vmatprep.subr.bf16.mxu0 %v5222_v11 }
 0x50b   :  { %3250 = vmatpush1.bf16.msra.mxu0 %v5223_v54 }
 0x50c   :  { %3252 = vmatprep.subr.bf16.mxu0 %v5224_v12  ;;  %v2175_v12 = vld [vmem:[%s4943_s2 + $0x50] sm:$0xff] }
 0x50f   :  { %3254 = vmatpush1.bf16.msra.mxu0 %v5225_v61 }
 0x510   :  { %3256 = vmatprep.subr.bf16.mxu0 %v5226_v3  ;;  %v2176_v3 = vld [vmem:[%s4943_s2 + $0x58] sm:$0xff] }
 0x513   :  { %3258 = vmatpush1.bf16.msra.mxu0 %v5227_v30 }
 0x514   :  { %3260 = vmatprep.subr.bf16.mxu0 %v5228_v60 }
 0x517   :  { %3262 = vmatpush1.bf16.msra.mxu0 %v5229_v44 }
 0x518   :  { %3264 = vmatprep.subr.bf16.mxu0 %v5230_v25 }
 0x51b   :  { %3266 = vmatpush1.bf16.msra.mxu0 %v5231_v14 }
 0x51c   :  { %3268 = vmatprep.subr.bf16.mxu0 %v5232_v48 }
 0x51f   :  { %3270 = vmatpush1.bf16.msra.mxu0 %v5233_v9 }
 0x520   :  { %3272 = vmatprep.subr.bf16.mxu0 %v5234_v10 }
 0x523   :  { %3274 = vmatpush1.bf16.msra.mxu0 %v5235_v4 }
 0x524   :  { %3276 = vmatprep.subr.bf16.mxu0 %v5236_v27 }
 0x527   :  { %3278 = vmatpush1.bf16.msra.mxu0 %v5237_v51 }
 0x528   :  { %3280 = vmatprep.subr.bf16.mxu0 %v5238_v8 }
 0x5bd   :  { %v1350_v28 = vpop.f32.mrb[8].mxu0 }
 0x5be   :  { %v3415_v0 = vadd.f32 %v2173_v55, %v1350_v28  ;;  %v1352_v11 = vpop.f32.mrb[9].mxu0 }
 0x5bf   :  { %v3416_v54 = vadd.f32 %v2174_v2, %v1352_v11 }
 0x5c0   :  { %v1361_v61 = vsub.f32 0.0, %v3415_v0 }
 0x5c1   :  { %v1362_v30 = vsub.f32 0.0, %v3416_v54  ;;  %v1356_v60 = vpop.f32.mrb[10].mxu0 }
 0x5c2   :  { %v1365_v44 = vmul.f32 1.442695, %v1361_v61  ;;  %v3417_v25 = vadd.f32 %v2175_v12, %v1356_v60  ;;  %v1358_v14 = vpop.f32.mrb[11].mxu0 }
 0x5c3   :  { %v1367_v48 = vmul.f32 1.442695, %v1362_v30  ;;  %v3418_v9 = vadd.f32 %v2176_v3, %v1358_v14 }
 0x5c4   :  { %3472 = vpow2.f32 %v1365_v44  ;;  %v1363_v10 = vsub.f32 0.0, %v3417_v25 }
 0x5c5   :  { %3474 = vpow2.f32 %v1367_v48  ;;  %v1364_v4 = vsub.f32 0.0, %v3418_v9 }
 0x5c6   :  { %v1369_v27 = vmul.f32 1.442695, %v1363_v10 }
 0x5c7   :  { %v1371_v51 = vmul.f32 1.442695, %v1364_v4 }
 0x5c8   :  { %3476 = vpow2.f32 %v1369_v27 }
 0x5c9   :  { %3478 = vpow2.f32 %v1371_v51 }
 0x5ce   :  { %v3473_v8 = vpop.eup %3472 }
 0x5cf   :  { %v3475_v55 = vpop.eup %3474  ;;  %v1373_v2 = vadd.f32 1.0, %v3473_v8 }
 0x5d0   :  { %v1374_v28 = vadd.f32 1.0, %v3475_v55 }
 0x5d1   :  { %3480 = vrcp.f32 %v1373_v2 }
 0x5d2   :  { %v3477_v11 = vpop.eup %3476  ;;  %3482 = vrcp.f32 %v1374_v28 }
 0x5d3   :  { %v3479_v61 = vpop.eup %3478  ;;  %v1375_v12 = vadd.f32 1.0, %v3477_v11 }
 0x5d4   :  { %v1376_v60 = vadd.f32 1.0, %v3479_v61 }
 0x5d5   :  { %3484 = vrcp.f32 %v1375_v12  ;;  %v5242_v12 = vld [vmem:[#allocation61_spill] sm:$0xff] }
 0x5d6   :  { %3486 = vrcp.f32 %v1376_v60 }
 0x5db   :  { %v3481_v3 = vpop.eup %3480 }
 0x5dc   :  { %v3483_v30 = vpop.eup %3482  ;;  %v1385_v44 = vmul.f32 %v3481_v3, %v3415_v0 }
 0x5dd   :  { %v1386_v14 = vmul.f32 %v3483_v30, %v3416_v54  ;;  %v5239_v54 = vld [vmem:[#allocation58_spill] sm:$0xff] }
 0x5de   :  { %v1393_v48 = vrot.slane %v1385_v44, 7 }
 0x5df   :  { %v3485_v10 = vpop.eup %3484  ;;  %v1394_v4 = vrot.slane %v1386_v14, 7 }
 0x5e0   :  { %v3487_v27 = vpop.eup %3486  ;;  %1405 = vst [vmem:[#allocation3] sm:$0xfe] %v1393_v48  ;;  %v1387_v51 = vmul.f32 %v3485_v10, %v3417_v25  ;;  %v5240_v25 = vld [vmem:[#allocation59_spill] sm:$0xff]  ;;  %v5244_v10 = vld [vmem:[#allocation64_spill] sm:$0xff] }
 0x5e1   :  { %1406 = vst [vmem:[#allocation3 + $0x8] sm:$0xfe] %v1394_v4  ;;  %v1388_v8 = vmul.f32 %v3487_v27, %v3418_v9  ;;  %v5241_v9 = vld [vmem:[#allocation60_spill] sm:$0xff]  ;;  %v5246_v27 = vld [vmem:[#allocation66_spill] sm:$0xff] }
 0x5e2   :  { %v1395_v55 = vrot.slane %v1387_v51, 7 }
 0x5e3   :  { %v1397_v2 = vrot.slane %v1388_v8, 7 }
 0x5e4   :  { %v4767_v28 = vsel %vm426_vm0, %v1393_v48, %v1395_v55  ;;  %1409 = vst [vmem:[#allocation3 + $0x20] sm:$0x1] %v1395_v55  ;;  %v5247_v55 = vld [vmem:[#allocation67_spill] sm:$0xff] }
 0x5e5   :  { %v1398_v11 = vsel %vm426_vm0, %v1394_v4, %v1397_v2  ;;  %1410 = vst [vmem:[#allocation3 + $0x28] sm:$0x1] %v1397_v2  ;;  %v5245_v4 = vld [vmem:[#allocation65_spill] sm:$0xff] }
 0x5e6   :  { %v1429_v30 = vrot.slane %v1398_v11, 2  ;;  %v5251_v2 = vld [vmem:[#allocation73_spill] sm:$0xff] }
 0x5e7   :  { %v1411_v0 = vld [vmem:[#allocation3] sm:$0xff] }
 0x5e8   :  { %v1412_v61 = vld [vmem:[#allocation3 + $0x8] sm:$0xff] }
 0x5e9   :  { %1503 = vmatprep.mubr.f32.mxu1 %v1412_v61  ;;  %v1416_v60 = vld [vmem:[#allocation3 + $0x8] sm:$0xfc] }
 0x5ea   :  { %1504 = vmatmul.mubr.f32.vlgmr.msra.gmra.mrb[24].mxu1 %v1411_v0  ;;  %v1428_v3 = vrot.slane %v1416_v60, 2 }
 0x5eb   :  { %3154 = vmatpush3.bf16.msra.mxu1 %v4227_v37  ;;  %1508 = vmatprep.mubr.f32.mxu1 %v1398_v11  ;;  %v1415_v11 = vld [vmem:[#allocation3] sm:$0xfc] }
 0x5ec   :  { %3156 = vmatprep.subr.bf16.mxu1 %v4229_v18  ;;  %v1430_v48 = vsel %vm459_vm1, %v1428_v3, %v1429_v30  ;;  %v1418_v61 = vld [vmem:[#allocation3 + $0x28] sm:$0x3]  ;;  %v1425_v0 = vrot.slane %v1415_v11, 2  ;;  %v1417_v3 = vld [vmem:[#allocation3 + $0x20] sm:$0x3] }
 0x5ed   :  { %v1433_v60 = vrot.slane %v1418_v61, 2  ;;  %v5252_v61 = vld [vmem:[#allocation37_spill] sm:$0xff] }
 0x5ee   :  { %1509 = vmatmul.mubr.f32.gmra.mrb[26].mxu1 %v4767_v28 }
 0x5ef   :  { %3158 = vmatpush3.bf16.msra.mxu1 %v4245_v47  ;;  %1578 = vmatprep.mubr.f32.mxu1 %v1386_v14  ;;  %v5243_v14 = vld [vmem:[#allocation63_spill] sm:$0xff] }
 0x5f0   :  { %3160 = vmatprep.subr.bf16.mxu1 %v4248_v38 }
 0x5f3   :  { %3162 = vmatpush3.bf16.msra.mxu1 %v5177_v26 }
 0x5f4   :  { %3164 = vmatprep.subr.bf16.mxu1 %v5178_v33 }
 0x5f7   :  { %3166 = vmatpush3.bf16.msra.mxu1 %v5179_v45 }
 0x5f8   :  { %3168 = vmatprep.subr.bf16.mxu1 %v5180_v57 }
 0x5fb   :  { %3170 = vmatpush3.bf16.msra.mxu1 %v5181_v46 }
 0x5fc   :  { %3172 = vmatprep.subr.bf16.mxu1 %v5182_v32 }
 0x5ff   :  { %3174 = vmatpush3.bf16.msra.mxu1 %v5183_v1 }
 0x600   :  { %3176 = vmatprep.subr.bf16.mxu1 %v5239_v54 }
 0x603   :  { %3178 = vmatpush3.bf16.msra.mxu1 %v5240_v25 }
 0x604   :  { %3180 = vmatprep.subr.bf16.mxu1 %v5241_v9 }
 0x607   :  { %3182 = vmatpush3.bf16.msra.mxu1 %v5242_v12 }
 0x608   :  { %3184 = vmatprep.subr.bf16.mxu1 %v5188_v15 }
 0x60a   :  { %1579 = vmatmul.mubr.f32.vlgmr.msra.gmra.mrb[28].mxu1 %v1385_v44  ;;  %v5248_v44 = vld [vmem:[#allocation68_spill] sm:$0xff] }
 0x60b   :  { %1583 = vmatprep.mubr.f32.mxu1 %v1388_v8  ;;  %3186 = vmatpush3.bf16.msra.mxu1 %v4372_v59  ;;  %v5249_v8 = vld [vmem:[#allocation71_spill] sm:$0xff] }
 0x60c   :  { %3188 = vmatprep.subr.bf16.mxu1 %v5243_v14 }
 0x60e   :  { %1584 = vmatmul.mubr.f32.gmra.mrb[30].mxu1 %v1387_v51  ;;  %v5250_v51 = vld [vmem:[#allocation72_spill] sm:$0xff] }
 0x60f   :  { %3190 = vmatpush3.bf16.msra.mxu1 %v5244_v10  ;;  %1653 = vmatprep.mubr.f32.mxu1 %v1430_v48  ;;  %v1426_v48 = vrot.slane %v4767_v28, 2  ;;  %v5253_v28 = vld [vmem:[#allocation38_spill] sm:$0xff] }
 0x610   :  { %3192 = vmatprep.subr.bf16.mxu1 %v5245_v4 }
 0x613   :  { %3194 = vmatpush3.bf16.msra.mxu1 %v5246_v27 }
 0x614   :  { %3196 = vmatprep.subr.bf16.mxu1 %v5247_v55 }
 0x617   :  { %3198 = vmatpush3.bf16.msra.mxu1 %v5248_v44 }
 0x618   :  { %3200 = vmatprep.subr.bf16.mxu1 %v5194_v20 }
 0x61b   :  { %3202 = vmatpush3.bf16.msra.mxu1 %v5195_v39 }
 0x61c   :  { %3204 = vmatprep.subr.bf16.mxu1 %v5249_v8  ;;  %v1427_v8 = vsel %vm459_vm1, %v1425_v0, %v1426_v48  ;;  %v5256_v0 = vld [vmem:[#allocation41_spill] sm:$0xff] }
 0x61f   :  { %3206 = vmatpush3.bf16.msra.mxu1 %v5250_v51  ;;  %v1431_v51 = vrot.slane %v1417_v3, 2  ;;  %v5264_v3 = vld [vmem:[#allocation49_spill] sm:$0xff] }
 0x620   :  { %3208 = vmatprep.subr.bf16.mxu1 %v5251_v2  ;;  %v1434_v2 = vsel %vm459_vm1, %v1429_v30, %v1433_v60  ;;  %v5258_v30 = vld [vmem:[#allocation43_spill] sm:$0xff]  ;;  %v5263_v60 = vld [vmem:[#allocation48_spill] sm:$0xff] }
 0x621   :  { %v1432_v11 = vsel %vm459_vm1, %v1426_v48, %v1431_v51  ;;  %v5261_v51 = vld [vmem:[#allocation46_spill] sm:$0xff] }
 0x623   :  { %3210 = vmatpush3.bf16.msra.mxu1 %v5199_v58 }
 0x624   :  { %3212 = vmatprep.subr.bf16.mxu1 %v4490_v36 }
 0x627   :  { %3214 = vmatpush3.bf16.msra.mxu1 %v4499_v52  ;;  %v5254_v52 = vld [vmem:[#allocation39_spill] sm:$0xff] }
 0x628   :  { %3312 = vmatprep.subr.bf16.mxu1 %v4041_v7  ;;  %v5255_v7 = vld [vmem:[#allocation40_spill] sm:$0xff] }
 0x62a   :  { %1654 = vmatmul.mubr.f32.vlgmr.msra.gmra.mrb[32].mxu1 %v1427_v8  ;;  %v5257_v8 = vld [vmem:[#allocation42_spill] sm:$0xff] }
 0x62b   :  { %1658 = vmatprep.mubr.f32.mxu1 %v1434_v2  ;;  %3314 = vmatpush3.bf16.msra.mxu1 %v4049_v24  ;;  %v5259_v24 = vld [vmem:[#allocation44_spill] sm:$0xff]  ;;  %v5262_v2 = vld [vmem:[#allocation47_spill] sm:$0xff] }
 0x62c   :  { %3316 = vmatprep.subr.bf16.mxu1 %v4059_v31  ;;  %v5260_v31 = vld [vmem:[#allocation45_spill] sm:$0xff] }
 0x62e   :  { %1659 = vmatmul.mubr.f32.gmra.mrb[34].mxu1 %v1432_v11 }
 0x62f   :  { %3318 = vmatpush3.bf16.msra.mxu1 %v5252_v61 }
 0x630   :  { %3320 = vmatprep.subr.bf16.mxu1 %v5253_v28 }
 0x633   :  { %3322 = vmatpush3.bf16.msra.mxu1 %v5254_v52  ;;  %v5265_v52 = vld [vmem:[#allocation50_spill] sm:$0xff] }
 0x634   :  { %3324 = vmatprep.subr.bf16.mxu1 %v5255_v7 }
 0x637   :  { %3326 = vmatpush3.bf16.msra.mxu1 %v5256_v0 }
 0x638   :  { %3328 = vmatprep.subr.bf16.mxu1 %v5257_v8 }
 0x63b   :  { %3330 = vmatpush3.bf16.msra.mxu1 %v5258_v30 }
 0x63c   :  { %3332 = vmatprep.subr.bf16.mxu1 %v5259_v24 }
 0x63f   :  { %3334 = vmatpush3.bf16.msra.mxu1 %v5260_v31 }
 0x640   :  { %3336 = vmatprep.subr.bf16.mxu1 %v5261_v51 }
 0x643   :  { %3338 = vmatpush3.bf16.msra.mxu1 %v5262_v2 }
 0x644   :  { %3340 = vmatprep.subr.bf16.mxu1 %v5263_v60 }
 0x647   :  { %3342 = vmatpush3.bf16.msra.mxu1 %v5264_v3 }
 0x648   :  { %3344 = vmatprep.subr.bf16.mxu1 %v5265_v52  ;;  %v2177_v52 = vld [vmem:[%s4945_s1 + $0x20] sm:$0xff] }
 0x6bd   :  { %v2443_v48 = vpop.f32.mrb[24].mxu1 }
 0x6be   :  { %v2444_v11 = vpop.f32.mrb[25].mxu1 }
 0x6bf   :  { %v2445_v61 = vadd.f32 %v2444_v11, %v2443_v48 }
 0x6c1   :  { %v2446_v28 = vpop.f32.mrb[26].mxu1  ;;  %v1506_v24 = vadd.f32 %v2445_v61, %v5205_v43  ;;  %v2178_v43 = vld [vmem:[%s4945_s1 + $0x28] sm:$0xff] }
 0x6c2   :  { %v2447_v7 = vpop.f32.mrb[27].mxu1 }
 0x6c3   :  { %v2448_v0 = vadd.f32 %v2447_v7, %v2446_v28  ;;  %v1675_v28 = vmul.f32 0.05, %v2177_v52 }
 0x6c5   :  { %v1511_v60 = vadd.f32 %v2448_v0, %v4535_v19 }
 0x6dd   :  { %v2481_v8 = vpop.f32.mrb[28].mxu1 }
 0x6de   :  { %v2482_v30 = vpop.f32.mrb[29].mxu1 }
 0x6df   :  { %v2483_v31 = vadd.f32 %v2482_v30, %v2481_v8 }
 0x6e1   :  { %v1581_v51 = vadd.f32 %v2483_v31, %v1506_v24  ;;  %v2484_v36 = vpop.f32.mrb[30].mxu1 }
 0x6e2   :  { %v2485_v2 = vpop.f32.mrb[31].mxu1 }
 0x6e3   :  { %v2486_v58 = vadd.f32 %v2485_v2, %v2484_v36 }
 0x6e5   :  { %v1586_v3 = vadd.f32 %v2486_v58, %v1511_v60  ;;  %v1676_v58 = vmul.f32 0.05, %v2178_v43 }
 0x6fd   :  { %v2519_v48 = vpop.f32.mrb[32].mxu1 }
 0x6fe   :  { %v2520_v11 = vpop.f32.mrb[33].mxu1 }
 0x6ff   :  { %v2521_v39 = vadd.f32 %v2520_v11, %v2519_v48 }
 0x701   :  { %v1656_v61 = vadd.f32 %v2521_v39, %v1581_v51  ;;  %v2522_v7 = vpop.f32.mrb[34].mxu1 }
 0x702   :  { %v2523_v8 = vpop.f32.mrb[35].mxu1 }
 0x703   :  { %v1664_v30 = vsub.f32 %v1656_v61, %v4691_v56  ;;  %v2524_v19 = vadd.f32 %v2523_v8, %v2522_v7  ;;  %v4833_v36 = vadd.f32 %v1675_v28, %v1656_v61 }
 0x705   :  { %v1666_v0 = vmul.f32 %v1664_v30, %v1664_v30  ;;  %v1661_v24 = vadd.f32 %v2524_v19, %v1586_v3  ;;  %1754 = vmatprep.mubr.f32.mxu0 %v4833_v36  ;;  %1679 = vst [vmem:[#allocation2 + $0x1] sm:$0xff] %v4833_v36 }
 0x707   :  { %v1668_v31 = vmul.f32 4.0, %v1666_v0  ;;  %v1665_v2 = vsub.f32 %v1661_v24, %v4696_v21  ;;  %v4838_v60 = vadd.f32 %v1676_v58, %v1661_v24 }
 0x709   :  { %v4841_v39 = vadd.f32 %v1668_v31, %v4698_v29  ;;  %v1667_v51 = vmul.f32 %v1665_v2, %v1665_v2  ;;  %1680 = vst [vmem:[#allocation2 + $0x9] sm:$0xff] %v4838_v60 }
 0x70b   :  { %v1669_v56 = vmul.f32 4.0, %v1667_v51 }
 0x70c   :  { %v1681_v52 = vld [vmem:[#allocation2] sm:$0xff] }
 0x70d   :  { %v4845_v48 = vadd.f32 %v1669_v56, %v4701_v42  ;;  %1755 = vmatmul.mubr.f32.vlgmr.msra.gmra.mrb[12].mxu0 %v1681_v52 }
 0x70e   :  { %3282 = vmatpush1.bf16.msra.mxu0 %v3875_v5  ;;  %1760 = vmatprep.mubr.f32.mxu0 %v4838_v60 }
 0x70f   :  { %3284 = vmatprep.subr.bf16.mxu0 %v3878_v6 }
 0x710   :  { %v1682_v21 = vld [vmem:[#allocation2 + $0x8] sm:$0xff] }
 0x711   :  { %1761 = vmatmul.mubr.f32.gmra.mrb[14].mxu0 %v1682_v21  ;;  %v1683_v5 = vld [vmem:[#allocation2 + $0x2] sm:$0xff]  ;;  %v1684_v6 = vld [vmem:[#allocation2 + $0xa] sm:$0xff] }
 0x712   :  { %3286 = vmatpush1.bf16.msra.mxu0 %v3893_v17  ;;  %1831 = vmatprep.mubr.f32.mxu0 %v5154_v13  ;;  %v2179_v17 = vld [vmem:[%s4943_s2 + $0x60] sm:$0xff] }
 0x713   :  { %3288 = vmatprep.subr.bf16.mxu0 %v3897_v23  ;;  %v2180_v23 = vld [vmem:[%s4943_s2 + $0x68] sm:$0xff] }
 0x716   :  { %3290 = vmatpush1.bf16.msra.mxu0 %v3912_v34 }
 0x717   :  { %3292 = vmatprep.subr.bf16.mxu0 %v3916_v35 }
 0x71a   :  { %3294 = vmatpush1.bf16.msra.mxu0 %v3931_v49 }
 0x71b   :  { %3296 = vmatprep.subr.bf16.mxu0 %v3934_v50 }
 0x71e   :  { %3298 = vmatpush1.bf16.msra.mxu0 %v3949_v62  ;;  %v2181_v62 = vld [vmem:[%s4943_s2 + $0x70] sm:$0xff] }
 0x71f   :  { %3300 = vmatprep.subr.bf16.mxu0 %v3952_v63 }
 0x722   :  { %3302 = vmatpush1.bf16.msra.mxu0 %v3967_v16  ;;  %v2182_v16 = vld [vmem:[%s4943_s2 + $0x78] sm:$0xff] }
 0x723   :  { %3304 = vmatprep.subr.bf16.mxu0 %v3970_v22 }
 0x726   :  { %3306 = vmatpush1.bf16.msra.mxu0 %v3985_v40 }
 0x727   :  { %3308 = vmatprep.subr.bf16.mxu0 %v3988_v41 }
 0x72a   :  { %3310 = vmatpush1.bf16.msra.mxu0 %v3997_v53 }
 0x72d   :  { %1832 = vmatmul.mubr.f32.vlgmr.msra.gmra.mrb[12].mxu0 %v1683_v5 }
 0x72e   :  { %1837 = vmatprep.mubr.f32.mxu0 %v5154_v13 }
 0x731   :  { %1838 = vmatmul.mubr.f32.gmra.mrb[14].mxu0 %v1684_v6 }
 0x800   :  { %v1833_v34 = vpop.f32.mrb[12].mxu0 }
 0x801   :  { %v3419_v35 = vadd.f32 %v2179_v17, %v1833_v34  ;;  %v1835_v49 = vpop.f32.mrb[13].mxu0 }
 0x802   :  { %v3420_v50 = vadd.f32 %v2180_v23, %v1835_v49 }
 0x803   :  { %v1844_v63 = vsub.f32 0.0, %v3419_v35 }
 0x804   :  { %v1845_v22 = vsub.f32 0.0, %v3420_v50  ;;  %v1839_v40 = vpop.f32.mrb[14].mxu0 }
 0x805   :  { %v1848_v41 = vmul.f32 1.442695, %v1844_v63  ;;  %v3421_v53 = vadd.f32 %v2181_v62, %v1839_v40  ;;  %v1841_v13 = vpop.f32.mrb[15].mxu0 }
 0x806   :  { %v1850_v29 = vmul.f32 1.442695, %v1845_v22  ;;  %v3422_v42 = vadd.f32 %v2182_v16, %v1841_v13  ;;  %v3504_v13 = vld [vmem:[%s4944_s3] sm:$0xff] }
 0x807   :  { %3488 = vpow2.f32 %v1848_v41  ;;  %v1846_v3 = vsub.f32 0.0, %v3421_v53 }
 0x808   :  { %3490 = vpow2.f32 %v1850_v29  ;;  %v1847_v11 = vsub.f32 0.0, %v3422_v42 }
 0x809   :  { %v1852_v28 = vmul.f32 1.442695, %v1846_v3 }
 0x80a   :  { %v1854_v43 = vmul.f32 1.442695, %v1847_v11 }
 0x80b   :  { %3492 = vpow2.f32 %v1852_v28 }
 0x80c   :  { %3494 = vpow2.f32 %v1854_v43  ;;  %v3505_v43 = vld [vmem:[%s4944_s3 + $0x8] sm:$0xff] }
 0x811   :  { %v3489_v61 = vpop.eup %3488 }
 0x812   :  { %v3491_v7 = vpop.eup %3490  ;;  %v1856_v8 = vadd.f32 1.0, %v3489_v61 }
 0x813   :  { %v1857_v30 = vadd.f32 1.0, %v3491_v7 }
 0x814   :  { %3496 = vrcp.f32 %v1856_v8 }
 0x815   :  { %v3493_v19 = vpop.eup %3492  ;;  %3498 = vrcp.f32 %v1857_v30 }
 0x816   :  { %v3495_v58 = vpop.eup %3494  ;;  %v1858_v0 = vadd.f32 1.0, %v3493_v19 }
 0x817   :  { %v1859_v24 = vadd.f32 1.0, %v3495_v58 }
 0x818   :  { %3500 = vrcp.f32 %v1858_v0 }
 0x819   :  { %3502 = vrcp.f32 %v1859_v24 }
 0x81e   :  { %v3497_v31 = vpop.eup %3496 }
 0x81f   :  { %v3499_v2 = vpop.eup %3498  ;;  %v1868_v51 = vmul.f32 %v3497_v31, %v3419_v35 }
 0x820   :  { %v1869_v56 = vmul.f32 %v3499_v2, %v3420_v50 }
 0x821   :  { %v1876_v52 = vrot.slane %v1868_v51, 7 }
 0x822   :  { %v3501_v21 = vpop.eup %3500  ;;  %v1877_v5 = vrot.slane %v1869_v56, 7 }
 0x823   :  { %v3503_v6 = vpop.eup %3502  ;;  %1888 = vst [vmem:[#allocation3] sm:$0xfe] %v1876_v52  ;;  %v1870_v17 = vmul.f32 %v3501_v21, %v3421_v53 }
 0x824   :  { %1889 = vst [vmem:[#allocation3 + $0x8] sm:$0xfe] %v1877_v5  ;;  %v1871_v23 = vmul.f32 %v3503_v6, %v3422_v42 }
 0x825   :  { %v1878_v34 = vrot.slane %v1870_v17, 7 }
 0x826   :  { %v1880_v49 = vrot.slane %v1871_v23, 7 }
 0x827   :  { %v4878_v62 = vsel %vm426_vm0, %v1876_v52, %v1878_v34  ;;  %1892 = vst [vmem:[#allocation3 + $0x20] sm:$0x1] %v1878_v34 }
 0x828   :  { %v1881_v63 = vsel %vm426_vm0, %v1877_v5, %v1880_v49  ;;  %1893 = vst [vmem:[#allocation3 + $0x28] sm:$0x1] %v1880_v49 }
 0x82a   :  { %v1894_v35 = vld [vmem:[#allocation3] sm:$0xff] }
 0x82b   :  { %v1895_v16 = vld [vmem:[#allocation3 + $0x8] sm:$0xff] }
 0x82c   :  { %1986 = vmatprep.mubr.f32.mxu1 %v1895_v16 }
 0x82d   :  { %1987 = vmatmul.mubr.f32.vlgmr.msra.gmra.mrb[36].mxu1 %v1894_v35 }
 0x82e   :  { %3346 = vmatpush3.bf16.msra.mxu1 %v4227_v37  ;;  %1991 = vmatprep.mubr.f32.mxu1 %v1881_v63  ;;  %v1899_v37 = vld [vmem:[#allocation3 + $0x8] sm:$0xfc] }
 0x82f   :  { %3348 = vmatprep.subr.bf16.mxu1 %v4229_v18  ;;  %v1911_v18 = vrot.slane %v1899_v37, 2 }
 0x831   :  { %1992 = vmatmul.mubr.f32.gmra.mrb[38].mxu1 %v4878_v62 }
 0x832   :  { %3350 = vmatpush3.bf16.msra.mxu1 %v4245_v47  ;;  %2061 = vmatprep.mubr.f32.mxu1 %v1869_v56  ;;  %v1912_v47 = vrot.slane %v1881_v63, 2 }
 0x833   :  { %3352 = vmatprep.subr.bf16.mxu1 %v4248_v38 }
 0x834   :  { %v1913_v38 = vsel %vm459_vm1, %v1911_v18, %v1912_v47 }
 0x836   :  { %3354 = vmatpush3.bf16.msra.mxu1 %v5177_v26  ;;  %v5267_v26 = vld [vmem:[#allocation71_spill] sm:$0xff] }
 0x837   :  { %3356 = vmatprep.subr.bf16.mxu1 %v5178_v33  ;;  %v5268_v33 = vld [vmem:[#allocation72_spill] sm:$0xff] }
 0x83a   :  { %3358 = vmatpush3.bf16.msra.mxu1 %v5179_v45  ;;  %v5269_v45 = vld [vmem:[#allocation73_spill] sm:$0xff] }
 0x83b   :  { %3360 = vmatprep.subr.bf16.mxu1 %v5180_v57  ;;  %v1898_v57 = vld [vmem:[#allocation3] sm:$0xfc] }
 0x83e   :  { %3362 = vmatpush3.bf16.msra.mxu1 %v5181_v46  ;;  %v5270_v46 = vld [vmem:[#allocation74_spill] sm:$0xff] }
 0x83f   :  { %3364 = vmatprep.subr.bf16.mxu1 %v5182_v32  ;;  %v1901_v32 = vld [vmem:[#allocation3 + $0x28] sm:$0x3] }
 0x842   :  { %3366 = vmatpush3.bf16.msra.mxu1 %v5183_v1  ;;  %v5271_v1 = vld [vmem:[#allocation75_spill] sm:$0xff] }
 0x843   :  { %3368 = vmatprep.subr.bf16.mxu1 %v5239_v54  ;;  %v1916_v54 = vrot.slane %v1901_v32, 2 }
 0x846   :  { %3370 = vmatpush3.bf16.msra.mxu1 %v5240_v25  ;;  %v1900_v25 = vld [vmem:[#allocation3 + $0x20] sm:$0x3] }
 0x847   :  { %3372 = vmatprep.subr.bf16.mxu1 %v5241_v9  ;;  %v1909_v9 = vrot.slane %v4878_v62, 2 }
 0x84a   :  { %3374 = vmatpush3.bf16.msra.mxu1 %v5242_v12 }
 0x84b   :  { %3376 = vmatprep.subr.bf16.mxu1 %v5188_v15  ;;  %v1908_v15 = vrot.slane %v1898_v57, 2 }
 0x84d   :  { %2062 = vmatmul.mubr.f32.vlgmr.msra.gmra.mrb[40].mxu1 %v1868_v51  ;;  %v1910_v12 = vsel %vm459_vm1, %v1908_v15, %v1909_v9 }
 0x84e   :  { %2066 = vmatprep.mubr.f32.mxu1 %v1871_v23  ;;  %3378 = vmatpush3.bf16.msra.mxu1 %v4372_v59  ;;  %v5266_v59 = vld [vmem:[#allocation70_spill] sm:$0xff] }
 0x84f   :  { %3380 = vmatprep.subr.bf16.mxu1 %v5243_v14  ;;  %v1914_v14 = vrot.slane %v1900_v25, 2 }
 0x851   :  { %2067 = vmatmul.mubr.f32.gmra.mrb[42].mxu1 %v1870_v17 }
 0x852   :  { %3382 = vmatpush3.bf16.msra.mxu1 %v5244_v10  ;;  %2136 = vmatprep.mubr.f32.mxu1 %v1913_v38  ;;  %v1917_v10 = vsel %vm459_vm1, %v1912_v47, %v1916_v54 }
 0x853   :  { %3384 = vmatprep.subr.bf16.mxu1 %v5245_v4  ;;  %v1915_v4 = vsel %vm459_vm1, %v1909_v9, %v1914_v14 }
 0x856   :  { %3386 = vmatpush3.bf16.msra.mxu1 %v5246_v27 }
 0x857   :  { %3388 = vmatprep.subr.bf16.mxu1 %v5247_v55 }
 0x85a   :  { %3390 = vmatpush3.bf16.msra.mxu1 %v5248_v44 }
 0x85b   :  { %3392 = vmatprep.subr.bf16.mxu1 %v5194_v20  ;;  %v5272_v20 = vld [vmem:[#allocation76_spill] sm:$0xff] }
 0x85e   :  { %3394 = vmatpush3.bf16.msra.mxu1 %v5266_v59 }
 0x85f   :  { %3396 = vmatprep.subr.bf16.mxu1 %v5267_v26 }
 0x862   :  { %3398 = vmatpush3.bf16.msra.mxu1 %v5268_v33 }
 0x863   :  { %3400 = vmatprep.subr.bf16.mxu1 %v5269_v45 }
 0x866   :  { %3402 = vmatpush3.bf16.msra.mxu1 %v5270_v46 }
 0x867   :  { %3404 = vmatprep.subr.bf16.mxu1 %v5271_v1 }
 0x86a   :  { %3406 = vmatpush3.bf16.msra.mxu1 %v5272_v20 }
 0x86d   :  { %2137 = vmatmul.mubr.f32.vlgmr.msra.gmra.mrb[44].mxu1 %v1910_v12 }
 0x86e   :  { %2141 = vmatprep.mubr.f32.mxu1 %v1917_v10 }
 0x871   :  { %2142 = vmatmul.mubr.f32.gmra.mrb[46].mxu1 %v1915_v4 }
 0x900   :  { %v2557_v27 = vpop.f32.mrb[36].mxu1 }
 0x901   :  { %v2558_v55 = vpop.f32.mrb[37].mxu1 }
 0x902   :  { %v2559_v44 = vadd.f32 %v2558_v55, %v2557_v27 }
 0x904   :  { %v2560_v50 = vpop.f32.mrb[38].mxu1  ;;  %v1989_v29 = vadd.f32 %v3504_v13, %v2559_v44 }
 0x905   :  { %v2561_v22 = vpop.f32.mrb[39].mxu1 }
 0x906   :  { %v2562_v40 = vadd.f32 %v2561_v22, %v2560_v50 }
 0x908   :  { %v1994_v61 = vadd.f32 %v3505_v43, %v2562_v40 }
 0x920   :  { %v2595_v41 = vpop.f32.mrb[40].mxu1 }
 0x921   :  { %v2596_v53 = vpop.f32.mrb[41].mxu1 }
 0x922   :  { %v2597_v42 = vadd.f32 %v2596_v53, %v2595_v41 }
 0x924   :  { %v2064_v3 = vadd.f32 %v2597_v42, %v1989_v29  ;;  %v2598_v11 = vpop.f32.mrb[42].mxu1 }
 0x925   :  { %v2599_v28 = vpop.f32.mrb[43].mxu1 }
 0x926   :  { %v2600_v7 = vadd.f32 %v2599_v28, %v2598_v11 }
 0x928   :  { %v2069_v8 = vadd.f32 %v2600_v7, %v1994_v61 }
 0x940   :  { %v2633_v30 = vpop.f32.mrb[44].mxu1 }
 0x941   :  { %v2634_v19 = vpop.f32.mrb[45].mxu1 }
 0x942   :  { %v2635_v58 = vadd.f32 %v2634_v19, %v2633_v30 }
 0x944   :  { %v2139_v0 = vadd.f32 %v2635_v58, %v2064_v3  ;;  %v2636_v24 = vpop.f32.mrb[46].mxu1 }
 0x945   :  { %v2637_v31 = vpop.f32.mrb[47].mxu1 }
 0x946   :  { %v2147_v2 = vsub.f32 %v2139_v0, %v4833_v36  ;;  %2155 = vst [vmem:[%s4946_s6] sm:$0xff] %v2139_v0  ;;  %v2638_v51 = vadd.f32 %v2637_v31, %v2636_v24 }
 0x948   :  { %v2149_v56 = vmul.f32 %v2147_v2, %v2147_v2  ;;  %v2144_v52 = vadd.f32 %v2638_v51, %v2069_v8 }
 0x94a   :  { %v2151_v21 = vmul.f32 4.0, %v2149_v56  ;;  %v2148_v5 = vsub.f32 %v2144_v52, %v4838_v60  ;;  %2156 = vst [vmem:[%s4946_s6 + $0x8] sm:$0xff] %v2144_v52 }
 0x94c   :  { %v2153_v6 = vadd.f32 %v2151_v21, %v4841_v39  ;;  %v2150_v17 = vmul.f32 %v2148_v5, %v2148_v5 }
 0x94e   :  { %2157 = vst [vmem:[%s4947_s7] sm:$0xff] %v2153_v6  ;;  %v2152_v36 = vmul.f32 4.0, %v2150_v17 }
 0x950   :  { %v2154_v23 = vadd.f32 %v2152_v36, %v4845_v48 }
 0x952   :  { %2158 = vst [vmem:[%s4947_s7 + $0x8] sm:$0xff] %v2154_v23 }

</bundles_post_ra>
